<compile_context>
chip_gen: v5e
topology: v5e:2x2
jax: 0.10.0
libtpu: 0.0.40
codegen_flags: <defaults>
</compile_context>

<pallas_src>
import functools

import numpy as np
import jax
import jax.numpy as jnp
from jax.experimental import pallas as pl
from jax.experimental.pallas import tpu as pltpu


# -----------------------------------------------------------------------------
# Fused Pallas kernel: for every radius branch, shared MLP (BN folded, ReLU) in
# the transposed orientation per sample slot, folded into a running max over
# nsample; branch outputs concatenated on sublanes, one transpose, lane-dense
# (TM, 128) store.
# -----------------------------------------------------------------------------
def _fused_mlp_pool_kernel(*refs, branch_meta, compute_dtype):
    # refs = (x_ref_0, ..., x_ref_{B-1}, wT_0_0, ..., wT_{B-1,last}, o_ref)
    n_br = len(branch_meta)
    x_refs = refs[:n_br]
    w_refs = refs[n_br:-1]
    o_ref = refs[-1]

    pooled = []
    w_pos = 0
    for k, (ns, n_layers) in enumerate(branch_meta):
        ws = [w_refs[w_pos + l][...] for l in range(n_layers)]   # (Cout_l, Cin_l)
        w_pos += n_layers

        acc = None
        for n in range(ns):                       # static unroll (ns = 8 / 16)
            h = x_refs[k][n]                      # (Cin, TM), compute_dtype
            for li, w in enumerate(ws):
                # (Cout_l, Cin_l) @ (Cin_l, TM): long TM dim on the MXU N axis
                h = jnp.dot(w, h, preferred_element_type=jnp.float32)
                h = jnp.maximum(h, 0.0)           # ReLU (folded-BN bias == 0)
                if li < n_layers - 1:
                    h = h.astype(compute_dtype)   # bf16 into the next matmul
            acc = h if acc is None else jnp.maximum(acc, h)
        pooled.append(acc)                        # (Cout_k, TM) f32

    out_cm = jnp.concatenate(pooled, axis=0)      # sublane concat -> (128, TM)
    o_ref[...] = out_cm.T.astype(o_ref.dtype)     # one XLU transpose, full-lane store


def fused_mlp_max_pool(grouped_list, weights_t, *, tm, compute_dtype=jnp.bfloat16):
    """grouped_list[k]: (ns_k, Cin_k, Mp) channel-major, compute_dtype;
       weights_t[k][l]: (Cout_l, Cin_l) compute_dtype (pre-packed, transposed).
       Returns (Mp, sum_k Cout_k) float32."""
    Mp = grouped_list[0].shape[-1]
    assert Mp % tm == 0, (Mp, tm)
    couts = [ws[-1].shape[0] for ws in weights_t]
    cout_total = int(sum(couts))

    in_specs, args, branch_meta = [], [], []
    flops = 0
    bytes_accessed = Mp * cout_total * 4          # f32 output
    for g, ws in zip(grouped_list, weights_t):
        ns, cin, _ = g.shape
        in_specs.append(pl.BlockSpec((ns, cin, tm), lambda i: (0, 0, i)))
        args.append(g)
        branch_meta.append((ns, len(ws)))
        bytes_accessed += g.size * g.dtype.itemsize
    for g, ws in zip(grouped_list, weights_t):
        ns = g.shape[0]
        for w in ws:
            in_specs.append(pl.BlockSpec(w.shape, lambda i: (0, 0)))  # VMEM-resident
            args.append(w)
            flops += 2 * ns * Mp * w.shape[0] * w.shape[1]
            bytes_accessed += w.size * w.dtype.itemsize

    kernel = functools.partial(_fused_mlp_pool_kernel,
                               branch_meta=tuple(branch_meta),
                               compute_dtype=compute_dtype)
    return pl.pallas_call(
        kernel,
        out_shape=jax.ShapeDtypeStruct((Mp, cout_total), jnp.float32),
        grid=(Mp // tm,),
        in_specs=in_specs,
        out_specs=pl.BlockSpec((tm, cout_total), lambda i: (i, 0)),
        compiler_params=pltpu.CompilerParams(dimension_semantics=("parallel",)),
        cost_estimate=pl.CostEstimate(flops=int(flops), transcendentals=0,
                                      bytes_accessed=int(bytes_accessed)),
    )(*args)


# -----------------------------------------------------------------------------
# Glue: QueryAndGroup (ball query + grouping) in plain JAX, emitting grouped
# data directly in the kernel's channel-major (ns, 3+C, Mp) layout (no separate
# HBM transpose pass).
# TODO(synk): ball query is a data-dependent gather; kept in JAX glue rather
#             than a Pallas kernel.  Batch ids use static numpy counts.
# -----------------------------------------------------------------------------
def ball_query_and_group(xyz, xyz_batch_cnt, new_xyz, new_xyz_batch_cnt,
                         features, radius, nsample, m_pad,
                         compute_dtype=jnp.bfloat16):
    M = new_xyz.shape[0]
    bid_xyz = jnp.asarray(np.repeat(np.arange(len(xyz_batch_cnt)), xyz_batch_cnt))
    bid_new = jnp.asarray(np.repeat(np.arange(len(new_xyz_batch_cnt)), new_xyz_batch_cnt))

    d2 = jnp.sum((new_xyz[:, None, :] - xyz[None, :, :]) ** 2, axis=-1)      # (M, N)
    valid = (d2 < radius * radius) & (bid_new[:, None] == bid_xyz[None, :])
    order = jnp.cumsum(valid.astype(jnp.int32), axis=1)                       # 1-indexed
    cnt = order[:, -1]

    idxs, hases = [], []
    for l in range(nsample):
        hit = valid & (order == l + 1)
        hases.append(jnp.any(hit, axis=1))
        idxs.append(jnp.argmax(hit, axis=1))
    idx = jnp.stack(idxs, axis=1)     # (M, ns)
    has = jnp.stack(hases, axis=1)

    # fill-first semantics: slots beyond the found count repeat the first hit
    first = idx[:, :1]
    idx = jnp.where(has, idx, first)
    empty = cnt == 0
    idx = jnp.where(empty[:, None], 0, idx)

    # pad M -> m_pad at the cheap index stage; padded rows marked empty -> zeroed
    new_xyz_p = new_xyz
    if m_pad > M:
        idx = jnp.pad(idx, ((0, m_pad - M), (0, 0)))
        empty = jnp.pad(empty, (0, m_pad - M), constant_values=True)
        new_xyz_p = jnp.pad(new_xyz, ((0, m_pad - M), (0, 0)))

    idx_t = idx.T                     # (ns, Mp)
    xyz_cm = xyz.T                    # (3, N)
    feat_cm = features.T              # (C, N)
    new_xyz_cm = new_xyz_p.T          # (3, Mp)

    # batched gather straight into channel-major (ns, C, Mp) — no transpose pass
    g_xyz = jax.vmap(lambda ii: xyz_cm[:, ii])(idx_t) - new_xyz_cm[None]   # (ns,3,Mp)
    g_feat = jax.vmap(lambda ii: feat_cm[:, ii])(idx_t)                    # (ns,C,Mp)
    grouped = jnp.concatenate([g_xyz, g_feat], axis=1)                     # (ns,3+C,Mp)
    grouped = jnp.where(empty[None, None, :], 0.0, grouped)                # empty balls
    return grouped.astype(compute_dtype)


# -----------------------------------------------------------------------------
# Parameter init (deterministic): Conv2d kaiming_normal, BN folded (eval mode).
# Folded bias is exactly zero (beta=0, running_mean=0) so no bias tensors.
# -----------------------------------------------------------------------------
def init_params(key, mlps, use_xyz=True, bn_eps=1e-5):
    params = []
    for spec in mlps:
        spec = list(spec)
        if use_xyz:
            spec[0] += 3
        ws = []
        for k in range(len(spec) - 1):
            key, sub = jax.random.split(key)
            cin, cout = spec[k], spec[k + 1]
            std = np.sqrt(2.0 / cin)                 # kaiming_normal_, fan_in
            w = jax.random.normal(sub, (cin, cout), jnp.float32) * std
            bn_scale = 1.0 / np.sqrt(1.0 + bn_eps)   # gamma=1, var=1
            ws.append(w * bn_scale)                  # fold BN scale into W
        params.append(ws)
    return params


def pack_params(params, compute_dtype=jnp.bfloat16):
    """Pre-pack once on the host: transpose to (Cout, Cin) and cast."""
    return [[jnp.asarray(w.T, dtype=compute_dtype) for w in ws] for ws in params]


# -----------------------------------------------------------------------------
# StackSAModuleMSG_for_cls forward
# -----------------------------------------------------------------------------
def stack_sa_module_msg(xyz, xyz_batch_cnt, new_xyz, new_xyz_batch_cnt, features,
                        radii, nsamples, packed_params, pool_method='max_pool',
                        compute_dtype=jnp.bfloat16):
    if pool_method != 'max_pool':
        raise NotImplementedError("only max_pool implemented")  # TODO(synk): avg_pool
    M = new_xyz.shape[0]
    tm = 256 if M >= 2048 else 128        # keep >= 4 grid steps for small M
    Mp = ((M + tm - 1) // tm) * tm

    grouped_list = [
        ball_query_and_group(xyz, xyz_batch_cnt, new_xyz, new_xyz_batch_cnt,
                             features, radii[k], nsamples[k], m_pad=Mp,
                             compute_dtype=compute_dtype)
        for k in range(len(radii))
    ]
    out = fused_mlp_max_pool(grouped_list, packed_params, tm=tm,
                             compute_dtype=compute_dtype)   # (Mp, sum Cout_k)
    return new_xyz, out[:M]


# pure-JAX reference for the kernel part (MLP + max pool), mirroring the
# kernel's dtype flow (bf16 operands, f32 accumulation, bf16 inter-layer).
def _ref_mlp_pool(grouped, ws_t):
    h = grouped                                    # (ns, Cin, Mp)
    for li, w in enumerate(ws_t):                  # w: (Cout, Cin)
        h = jnp.einsum('oc,ncm->nom', w, h, preferred_element_type=jnp.float32)
        h = jnp.maximum(h, 0.0)
        if li < len(ws_t) - 1:
            h = h.astype(w.dtype)
    return jnp.max(h, axis=0).T                    # (Mp, Cout)


if __name__ == "__main__":
    key = jax.random.PRNGKey(0)
    k1, k2, k3, k4 = jax.random.split(key, 4)

    radii = [0.5, 1.0]
    nsamples = [8, 16]
    mlps = [[13, 32, 64], [13, 32, 64]]   # +3 for use_xyz -> Cin = 16 each

    xyz_batch_cnt = np.array([512, 512], dtype=np.int32)      # N = 1024
    new_xyz_batch_cnt = np.array([256, 256], dtype=np.int32)  # M = 512
    N = int(xyz_batch_cnt.sum())
    M = int(new_xyz_batch_cnt.sum())
    C = 13

    xyz = jax.random.uniform(k1, (N, 3), jnp.float32)
    new_xyz = jax.random.uniform(k2, (M, 3), jnp.float32)
    features = jax.random.normal(k3, (N, C), jnp.float32)

    params = init_params(k4, mlps, use_xyz=True)
    packed = pack_params(params, jnp.bfloat16)

    out_xyz, out_feat = stack_sa_module_msg(
        xyz, xyz_batch_cnt, new_xyz, new_xyz_batch_cnt, features,
        radii, nsamples, packed, pool_method='max_pool',
        compute_dtype=jnp.bfloat16)
    out_feat = jax.block_until_ready(out_feat)

    # sanity check against a pure-JAX reference (same bf16-in / f32-acc flow)
    ref_chunks = []
    for k in range(len(radii)):
        g = ball_query_and_group(xyz, xyz_batch_cnt, new_xyz, new_xyz_batch_cnt,
                                 features, radii[k], nsamples[k], m_pad=M,
                                 compute_dtype=jnp.bfloat16)
        ref_chunks.append(_ref_mlp_pool(g, packed[k]))
    ref = jnp.concatenate(ref_chunks, axis=1)

    assert out_feat.shape == (M, sum(m[-1] for m in mlps)), out_feat.shape
    np.testing.assert_allclose(np.asarray(out_feat), np.asarray(ref),
                               rtol=5e-3, atol=5e-3)
    print("KERNEL_OK")
</pallas_src>

<mosaic_0001>
module attributes {stable_mosaic.version = 11 : i64} {
  func.func @_fused_mlp_pool_kernel(%arg0: i32, %arg1: memref<8x16x128xbf16, #tpu.memory_space<vmem>>, %arg2: memref<16x16x128xbf16, #tpu.memory_space<vmem>>, %arg3: memref<32x16xbf16, #tpu.memory_space<vmem>>, %arg4: memref<64x32xbf16, #tpu.memory_space<vmem>>, %arg5: memref<32x16xbf16, #tpu.memory_space<vmem>>, %arg6: memref<64x32xbf16, #tpu.memory_space<vmem>>, %arg7: memref<128x128xf32, #tpu.memory_space<vmem>>) attributes {dimension_semantics = [#tpu.dimension_semantics<parallel>], iteration_bounds = array<i64: 4>, scalar_prefetch = 0 : i64, scratch_operands = 0 : i64, tpu.core_type = #tpu.core_type<tc>, window_params = [{transform_indices = @transform_0, window_bounds = array<i64: 8, 16, 128>}, {transform_indices = @transform_1, window_bounds = array<i64: 16, 16, 128>}, {pipeline_mode = #tpu.pipeline_mode<synchronous>, transform_indices = @transform_2, window_bounds = array<i64: 32, 16>}, {pipeline_mode = #tpu.pipeline_mode<synchronous>, transform_indices = @transform_3, window_bounds = array<i64: 64, 32>}, {pipeline_mode = #tpu.pipeline_mode<synchronous>, transform_indices = @transform_4, window_bounds = array<i64: 32, 16>}, {pipeline_mode = #tpu.pipeline_mode<synchronous>, transform_indices = @transform_5, window_bounds = array<i64: 64, 32>}, {transform_indices = @transform_6, window_bounds = array<i64: 128, 128>}]} {
    %c0 = arith.constant 0 : index
    %c0_0 = arith.constant 0 : index
    %0 = vector.load %arg3[%c0, %c0_0] : memref<32x16xbf16, #tpu.memory_space<vmem>>, vector<32x16xbf16>
    %c0_1 = arith.constant 0 : index
    %c0_2 = arith.constant 0 : index
    %1 = vector.load %arg4[%c0_1, %c0_2] : memref<64x32xbf16, #tpu.memory_space<vmem>>, vector<64x32xbf16>
    %c0_3 = arith.constant 0 : index
    %c0_4 = arith.constant 0 : index
    %c0_5 = arith.constant 0 : index
    %2 = vector.load %arg1[%c0_3, %c0_4, %c0_5] : memref<8x16x128xbf16, #tpu.memory_space<vmem>>, vector<1x16x128xbf16>
    %3 = vector.shape_cast %2 : vector<1x16x128xbf16> to vector<16x128xbf16>
    %cst = arith.constant dense<0.000000e+00> : vector<32x128xf32>
    %4 = tpu.matmul %0, %3, %cst {dimension_numbers = #tpu.dot_dimension_numbers<[1], [0], [0], [1], [0, 0, 1, 1], [], []>} : vector<32x16xbf16>, vector<16x128xbf16>, vector<32x128xf32> -> vector<32x128xf32>
    %cst_6 = arith.constant 0.000000e+00 : f32
    %5 = vector.broadcast %cst_6 : f32 to vector<32x128xf32>
    %6 = arith.maximumf %4, %5 : vector<32x128xf32>
    %7 = arith.truncf %6 : vector<32x128xf32> to vector<32x128xbf16>
    %cst_7 = arith.constant dense<0.000000e+00> : vector<64x128xf32>
    %8 = tpu.matmul %1, %7, %cst_7 {dimension_numbers = #tpu.dot_dimension_numbers<[1], [0], [0], [1], [0, 0, 1, 1], [], []>} : vector<64x32xbf16>, vector<32x128xbf16>, vector<64x128xf32> -> vector<64x128xf32>
    %cst_8 = arith.constant 0.000000e+00 : f32
    %9 = vector.broadcast %cst_8 : f32 to vector<64x128xf32>
    %10 = arith.maximumf %8, %9 : vector<64x128xf32>
    %c1 = arith.constant 1 : index
    %c0_9 = arith.constant 0 : index
    %c0_10 = arith.constant 0 : index
    %11 = vector.load %arg1[%c1, %c0_9, %c0_10] : memref<8x16x128xbf16, #tpu.memory_space<vmem>>, vector<1x16x128xbf16>
    %12 = vector.shape_cast %11 : vector<1x16x128xbf16> to vector<16x128xbf16>
    %cst_11 = arith.constant dense<0.000000e+00> : vector<32x128xf32>
    %13 = tpu.matmul %0, %12, %cst_11 {dimension_numbers = #tpu.dot_dimension_numbers<[1], [0], [0], [1], [0, 0, 1, 1], [], []>} : vector<32x16xbf16>, vector<16x128xbf16>, vector<32x128xf32> -> vector<32x128xf32>
    %cst_12 = arith.constant 0.000000e+00 : f32
    %14 = vector.broadcast %cst_12 : f32 to vector<32x128xf32>
    %15 = arith.maximumf %13, %14 : vector<32x128xf32>
    %16 = arith.truncf %15 : vector<32x128xf32> to vector<32x128xbf16>
    %cst_13 = arith.constant dense<0.000000e+00> : vector<64x128xf32>
    %17 = tpu.matmul %1, %16, %cst_13 {dimension_numbers = #tpu.dot_dimension_numbers<[1], [0], [0], [1], [0, 0, 1, 1], [], []>} : vector<64x32xbf16>, vector<32x128xbf16>, vector<64x128xf32> -> vector<64x128xf32>
    %cst_14 = arith.constant 0.000000e+00 : f32
    %18 = vector.broadcast %cst_14 : f32 to vector<64x128xf32>
    %19 = arith.maximumf %17, %18 : vector<64x128xf32>
    %20 = arith.maximumf %10, %19 : vector<64x128xf32>
    %c2 = arith.constant 2 : index
    %c0_15 = arith.constant 0 : index
    %c0_16 = arith.constant 0 : index
    %21 = vector.load %arg1[%c2, %c0_15, %c0_16] : memref<8x16x128xbf16, #tpu.memory_space<vmem>>, vector<1x16x128xbf16>
    %22 = vector.shape_cast %21 : vector<1x16x128xbf16> to vector<16x128xbf16>
    %cst_17 = arith.constant dense<0.000000e+00> : vector<32x128xf32>
    %23 = tpu.matmul %0, %22, %cst_17 {dimension_numbers = #tpu.dot_dimension_numbers<[1], [0], [0], [1], [0, 0, 1, 1], [], []>} : vector<32x16xbf16>, vector<16x128xbf16>, vector<32x128xf32> -> vector<32x128xf32>
    %cst_18 = arith.constant 0.000000e+00 : f32
    %24 = vector.broadcast %cst_18 : f32 to vector<32x128xf32>
    %25 = arith.maximumf %23, %24 : vector<32x128xf32>
    %26 = arith.truncf %25 : vector<32x128xf32> to vector<32x128xbf16>
    %cst_19 = arith.constant dense<0.000000e+00> : vector<64x128xf32>
    %27 = tpu.matmul %1, %26, %cst_19 {dimension_numbers = #tpu.dot_dimension_numbers<[1], [0], [0], [1], [0, 0, 1, 1], [], []>} : vector<64x32xbf16>, vector<32x128xbf16>, vector<64x128xf32> -> vector<64x128xf32>
    %cst_20 = arith.constant 0.000000e+00 : f32
    %28 = vector.broadcast %cst_20 : f32 to vector<64x128xf32>
    %29 = arith.maximumf %27, %28 : vector<64x128xf32>
    %30 = arith.maximumf %20, %29 : vector<64x128xf32>
    %c3 = arith.constant 3 : index
    %c0_21 = arith.constant 0 : index
    %c0_22 = arith.constant 0 : index
    %31 = vector.load %arg1[%c3, %c0_21, %c0_22] : memref<8x16x128xbf16, #tpu.memory_space<vmem>>, vector<1x16x128xbf16>
    %32 = vector.shape_cast %31 : vector<1x16x128xbf16> to vector<16x128xbf16>
    %cst_23 = arith.constant dense<0.000000e+00> : vector<32x128xf32>
    %33 = tpu.matmul %0, %32, %cst_23 {dimension_numbers = #tpu.dot_dimension_numbers<[1], [0], [0], [1], [0, 0, 1, 1], [], []>} : vector<32x16xbf16>, vector<16x128xbf16>, vector<32x128xf32> -> vector<32x128xf32>
    %cst_24 = arith.constant 0.000000e+00 : f32
    %34 = vector.broadcast %cst_24 : f32 to vector<32x128xf32>
    %35 = arith.maximumf %33, %34 : vector<32x128xf32>
    %36 = arith.truncf %35 : vector<32x128xf32> to vector<32x128xbf16>
    %cst_25 = arith.constant dense<0.000000e+00> : vector<64x128xf32>
    %37 = tpu.matmul %1, %36, %cst_25 {dimension_numbers = #tpu.dot_dimension_numbers<[1], [0], [0], [1], [0, 0, 1, 1], [], []>} : vector<64x32xbf16>, vector<32x128xbf16>, vector<64x128xf32> -> vector<64x128xf32>
    %cst_26 = arith.constant 0.000000e+00 : f32
    %38 = vector.broadcast %cst_26 : f32 to vector<64x128xf32>
    %39 = arith.maximumf %37, %38 : vector<64x128xf32>
    %40 = arith.maximumf %30, %39 : vector<64x128xf32>
    %c4 = arith.constant 4 : index
    %c0_27 = arith.constant 0 : index
    %c0_28 = arith.constant 0 : index
    %41 = vector.load %arg1[%c4, %c0_27, %c0_28] : memref<8x16x128xbf16, #tpu.memory_space<vmem>>, vector<1x16x128xbf16>
    %42 = vector.shape_cast %41 : vector<1x16x128xbf16> to vector<16x128xbf16>
    %cst_29 = arith.constant dense<0.000000e+00> : vector<32x128xf32>
    %43 = tpu.matmul %0, %42, %cst_29 {dimension_numbers = #tpu.dot_dimension_numbers<[1], [0], [0], [1], [0, 0, 1, 1], [], []>} : vector<32x16xbf16>, vector<16x128xbf16>, vector<32x128xf32> -> vector<32x128xf32>
    %cst_30 = arith.constant 0.000000e+00 : f32
    %44 = vector.broadcast %cst_30 : f32 to vector<32x128xf32>
    %45 = arith.maximumf %43, %44 : vector<32x128xf32>
    %46 = arith.truncf %45 : vector<32x128xf32> to vector<32x128xbf16>
    %cst_31 = arith.constant dense<0.000000e+00> : vector<64x128xf32>
    %47 = tpu.matmul %1, %46, %cst_31 {dimension_numbers = #tpu.dot_dimension_numbers<[1], [0], [0], [1], [0, 0, 1, 1], [], []>} : vector<64x32xbf16>, vector<32x128xbf16>, vector<64x128xf32> -> vector<64x128xf32>
    %cst_32 = arith.constant 0.000000e+00 : f32
    %48 = vector.broadcast %cst_32 : f32 to vector<64x128xf32>
    %49 = arith.maximumf %47, %48 : vector<64x128xf32>
    %50 = arith.maximumf %40, %49 : vector<64x128xf32>
    %c5 = arith.constant 5 : index
    %c0_33 = arith.constant 0 : index
    %c0_34 = arith.constant 0 : index
    %51 = vector.load %arg1[%c5, %c0_33, %c0_34] : memref<8x16x128xbf16, #tpu.memory_space<vmem>>, vector<1x16x128xbf16>
    %52 = vector.shape_cast %51 : vector<1x16x128xbf16> to vector<16x128xbf16>
    %cst_35 = arith.constant dense<0.000000e+00> : vector<32x128xf32>
    %53 = tpu.matmul %0, %52, %cst_35 {dimension_numbers = #tpu.dot_dimension_numbers<[1], [0], [0], [1], [0, 0, 1, 1], [], []>} : vector<32x16xbf16>, vector<16x128xbf16>, vector<32x128xf32> -> vector<32x128xf32>
    %cst_36 = arith.constant 0.000000e+00 : f32
    %54 = vector.broadcast %cst_36 : f32 to vector<32x128xf32>
    %55 = arith.maximumf %53, %54 : vector<32x128xf32>
    %56 = arith.truncf %55 : vector<32x128xf32> to vector<32x128xbf16>
    %cst_37 = arith.constant dense<0.000000e+00> : vector<64x128xf32>
    %57 = tpu.matmul %1, %56, %cst_37 {dimension_numbers = #tpu.dot_dimension_numbers<[1], [0], [0], [1], [0, 0, 1, 1], [], []>} : vector<64x32xbf16>, vector<32x128xbf16>, vector<64x128xf32> -> vector<64x128xf32>
    %cst_38 = arith.constant 0.000000e+00 : f32
    %58 = vector.broadcast %cst_38 : f32 to vector<64x128xf32>
    %59 = arith.maximumf %57, %58 : vector<64x128xf32>
    %60 = arith.maximumf %50, %59 : vector<64x128xf32>
    %c6 = arith.constant 6 : index
    %c0_39 = arith.constant 0 : index
    %c0_40 = arith.constant 0 : index
    %61 = vector.load %arg1[%c6, %c0_39, %c0_40] : memref<8x16x128xbf16, #tpu.memory_space<vmem>>, vector<1x16x128xbf16>
    %62 = vector.shape_cast %61 : vector<1x16x128xbf16> to vector<16x128xbf16>
    %cst_41 = arith.constant dense<0.000000e+00> : vector<32x128xf32>
    %63 = tpu.matmul %0, %62, %cst_41 {dimension_numbers = #tpu.dot_dimension_numbers<[1], [0], [0], [1], [0, 0, 1, 1], [], []>} : vector<32x16xbf16>, vector<16x128xbf16>, vector<32x128xf32> -> vector<32x128xf32>
    %cst_42 = arith.constant 0.000000e+00 : f32
    %64 = vector.broadcast %cst_42 : f32 to vector<32x128xf32>
    %65 = arith.maximumf %63, %64 : vector<32x128xf32>
    %66 = arith.truncf %65 : vector<32x128xf32> to vector<32x128xbf16>
    %cst_43 = arith.constant dense<0.000000e+00> : vector<64x128xf32>
    %67 = tpu.matmul %1, %66, %cst_43 {dimension_numbers = #tpu.dot_dimension_numbers<[1], [0], [0], [1], [0, 0, 1, 1], [], []>} : vector<64x32xbf16>, vector<32x128xbf16>, vector<64x128xf32> -> vector<64x128xf32>
    %cst_44 = arith.constant 0.000000e+00 : f32
    %68 = vector.broadcast %cst_44 : f32 to vector<64x128xf32>
    %69 = arith.maximumf %67, %68 : vector<64x128xf32>
    %70 = arith.maximumf %60, %69 : vector<64x128xf32>
    %c7 = arith.constant 7 : index
    %c0_45 = arith.constant 0 : index
    %c0_46 = arith.constant 0 : index
    %71 = vector.load %arg1[%c7, %c0_45, %c0_46] : memref<8x16x128xbf16, #tpu.memory_space<vmem>>, vector<1x16x128xbf16>
    %72 = vector.shape_cast %71 : vector<1x16x128xbf16> to vector<16x128xbf16>
    %cst_47 = arith.constant dense<0.000000e+00> : vector<32x128xf32>
    %73 = tpu.matmul %0, %72, %cst_47 {dimension_numbers = #tpu.dot_dimension_numbers<[1], [0], [0], [1], [0, 0, 1, 1], [], []>} : vector<32x16xbf16>, vector<16x128xbf16>, vector<32x128xf32> -> vector<32x128xf32>
    %cst_48 = arith.constant 0.000000e+00 : f32
    %74 = vector.broadcast %cst_48 : f32 to vector<32x128xf32>
    %75 = arith.maximumf %73, %74 : vector<32x128xf32>
    %76 = arith.truncf %75 : vector<32x128xf32> to vector<32x128xbf16>
    %cst_49 = arith.constant dense<0.000000e+00> : vector<64x128xf32>
    %77 = tpu.matmul %1, %76, %cst_49 {dimension_numbers = #tpu.dot_dimension_numbers<[1], [0], [0], [1], [0, 0, 1, 1], [], []>} : vector<64x32xbf16>, vector<32x128xbf16>, vector<64x128xf32> -> vector<64x128xf32>
    %cst_50 = arith.constant 0.000000e+00 : f32
    %78 = vector.broadcast %cst_50 : f32 to vector<64x128xf32>
    %79 = arith.maximumf %77, %78 : vector<64x128xf32>
    %80 = arith.maximumf %70, %79 : vector<64x128xf32>
    %c0_51 = arith.constant 0 : index
    %c0_52 = arith.constant 0 : index
    %81 = vector.load %arg5[%c0_51, %c0_52] : memref<32x16xbf16, #tpu.memory_space<vmem>>, vector<32x16xbf16>
    %c0_53 = arith.constant 0 : index
    %c0_54 = arith.constant 0 : index
    %82 = vector.load %arg6[%c0_53, %c0_54] : memref<64x32xbf16, #tpu.memory_space<vmem>>, vector<64x32xbf16>
    %c0_55 = arith.constant 0 : index
    %c0_56 = arith.constant 0 : index
    %c0_57 = arith.constant 0 : index
    %83 = vector.load %arg2[%c0_55, %c0_56, %c0_57] : memref<16x16x128xbf16, #tpu.memory_space<vmem>>, vector<1x16x128xbf16>
    %84 = vector.shape_cast %83 : vector<1x16x128xbf16> to vector<16x128xbf16>
    %cst_58 = arith.constant dense<0.000000e+00> : vector<32x128xf32>
    %85 = tpu.matmul %81, %84, %cst_58 {dimension_numbers = #tpu.dot_dimension_numbers<[1], [0], [0], [1], [0, 0, 1, 1], [], []>} : vector<32x16xbf16>, vector<16x128xbf16>, vector<32x128xf32> -> vector<32x128xf32>
    %cst_59 = arith.constant 0.000000e+00 : f32
    %86 = vector.broadcast %cst_59 : f32 to vector<32x128xf32>
    %87 = arith.maximumf %85, %86 : vector<32x128xf32>
    %88 = arith.truncf %87 : vector<32x128xf32> to vector<32x128xbf16>
    %cst_60 = arith.constant dense<0.000000e+00> : vector<64x128xf32>
    %89 = tpu.matmul %82, %88, %cst_60 {dimension_numbers = #tpu.dot_dimension_numbers<[1], [0], [0], [1], [0, 0, 1, 1], [], []>} : vector<64x32xbf16>, vector<32x128xbf16>, vector<64x128xf32> -> vector<64x128xf32>
    %cst_61 = arith.constant 0.000000e+00 : f32
    %90 = vector.broadcast %cst_61 : f32 to vector<64x128xf32>
    %91 = arith.maximumf %89, %90 : vector<64x128xf32>
    %c1_62 = arith.constant 1 : index
    %c0_63 = arith.constant 0 : index
    %c0_64 = arith.constant 0 : index
    %92 = vector.load %arg2[%c1_62, %c0_63, %c0_64] : memref<16x16x128xbf16, #tpu.memory_space<vmem>>, vector<1x16x128xbf16>
    %93 = vector.shape_cast %92 : vector<1x16x128xbf16> to vector<16x128xbf16>
    %cst_65 = arith.constant dense<0.000000e+00> : vector<32x128xf32>
    %94 = tpu.matmul %81, %93, %cst_65 {dimension_numbers = #tpu.dot_dimension_numbers<[1], [0], [0], [1], [0, 0, 1, 1], [], []>} : vector<32x16xbf16>, vector<16x128xbf16>, vector<32x128xf32> -> vector<32x128xf32>
    %cst_66 = arith.constant 0.000000e+00 : f32
    %95 = vector.broadcast %cst_66 : f32 to vector<32x128xf32>
    %96 = arith.maximumf %94, %95 : vector<32x128xf32>
    %97 = arith.truncf %96 : vector<32x128xf32> to vector<32x128xbf16>
    %cst_67 = arith.constant dense<0.000000e+00> : vector<64x128xf32>
    %98 = tpu.matmul %82, %97, %cst_67 {dimension_numbers = #tpu.dot_dimension_numbers<[1], [0], [0], [1], [0, 0, 1, 1], [], []>} : vector<64x32xbf16>, vector<32x128xbf16>, vector<64x128xf32> -> vector<64x128xf32>
    %cst_68 = arith.constant 0.000000e+00 : f32
    %99 = vector.broadcast %cst_68 : f32 to vector<64x128xf32>
    %100 = arith.maximumf %98, %99 : vector<64x128xf32>
    %101 = arith.maximumf %91, %100 : vector<64x128xf32>
    %c2_69 = arith.constant 2 : index
    %c0_70 = arith.constant 0 : index
    %c0_71 = arith.constant 0 : index
    %102 = vector.load %arg2[%c2_69, %c0_70, %c0_71] : memref<16x16x128xbf16, #tpu.memory_space<vmem>>, vector<1x16x128xbf16>
    %103 = vector.shape_cast %102 : vector<1x16x128xbf16> to vector<16x128xbf16>
    %cst_72 = arith.constant dense<0.000000e+00> : vector<32x128xf32>
    %104 = tpu.matmul %81, %103, %cst_72 {dimension_numbers = #tpu.dot_dimension_numbers<[1], [0], [0], [1], [0, 0, 1, 1], [], []>} : vector<32x16xbf16>, vector<16x128xbf16>, vector<32x128xf32> -> vector<32x128xf32>
    %cst_73 = arith.constant 0.000000e+00 : f32
    %105 = vector.broadcast %cst_73 : f32 to vector<32x128xf32>
    %106 = arith.maximumf %104, %105 : vector<32x128xf32>
    %107 = arith.truncf %106 : vector<32x128xf32> to vector<32x128xbf16>
    %cst_74 = arith.constant dense<0.000000e+00> : vector<64x128xf32>
    %108 = tpu.matmul %82, %107, %cst_74 {dimension_numbers = #tpu.dot_dimension_numbers<[1], [0], [0], [1], [0, 0, 1, 1], [], []>} : vector<64x32xbf16>, vector<32x128xbf16>, vector<64x128xf32> -> vector<64x128xf32>
    %cst_75 = arith.constant 0.000000e+00 : f32
    %109 = vector.broadcast %cst_75 : f32 to vector<64x128xf32>
    %110 = arith.maximumf %108, %109 : vector<64x128xf32>
    %111 = arith.maximumf %101, %110 : vector<64x128xf32>
    %c3_76 = arith.constant 3 : index
    %c0_77 = arith.constant 0 : index
    %c0_78 = arith.constant 0 : index
    %112 = vector.load %arg2[%c3_76, %c0_77, %c0_78] : memref<16x16x128xbf16, #tpu.memory_space<vmem>>, vector<1x16x128xbf16>
    %113 = vector.shape_cast %112 : vector<1x16x128xbf16> to vector<16x128xbf16>
    %cst_79 = arith.constant dense<0.000000e+00> : vector<32x128xf32>
    %114 = tpu.matmul %81, %113, %cst_79 {dimension_numbers = #tpu.dot_dimension_numbers<[1], [0], [0], [1], [0, 0, 1, 1], [], []>} : vector<32x16xbf16>, vector<16x128xbf16>, vector<32x128xf32> -> vector<32x128xf32>
    %cst_80 = arith.constant 0.000000e+00 : f32
    %115 = vector.broadcast %cst_80 : f32 to vector<32x128xf32>
    %116 = arith.maximumf %114, %115 : vector<32x128xf32>
    %117 = arith.truncf %116 : vector<32x128xf32> to vector<32x128xbf16>
    %cst_81 = arith.constant dense<0.000000e+00> : vector<64x128xf32>
    %118 = tpu.matmul %82, %117, %cst_81 {dimension_numbers = #tpu.dot_dimension_numbers<[1], [0], [0], [1], [0, 0, 1, 1], [], []>} : vector<64x32xbf16>, vector<32x128xbf16>, vector<64x128xf32> -> vector<64x128xf32>
    %cst_82 = arith.constant 0.000000e+00 : f32
    %119 = vector.broadcast %cst_82 : f32 to vector<64x128xf32>
    %120 = arith.maximumf %118, %119 : vector<64x128xf32>
    %121 = arith.maximumf %111, %120 : vector<64x128xf32>
    %c4_83 = arith.constant 4 : index
    %c0_84 = arith.constant 0 : index
    %c0_85 = arith.constant 0 : index
    %122 = vector.load %arg2[%c4_83, %c0_84, %c0_85] : memref<16x16x128xbf16, #tpu.memory_space<vmem>>, vector<1x16x128xbf16>
    %123 = vector.shape_cast %122 : vector<1x16x128xbf16> to vector<16x128xbf16>
    %cst_86 = arith.constant dense<0.000000e+00> : vector<32x128xf32>
    %124 = tpu.matmul %81, %123, %cst_86 {dimension_numbers = #tpu.dot_dimension_numbers<[1], [0], [0], [1], [0, 0, 1, 1], [], []>} : vector<32x16xbf16>, vector<16x128xbf16>, vector<32x128xf32> -> vector<32x128xf32>
    %cst_87 = arith.constant 0.000000e+00 : f32
    %125 = vector.broadcast %cst_87 : f32 to vector<32x128xf32>
    %126 = arith.maximumf %124, %125 : vector<32x128xf32>
    %127 = arith.truncf %126 : vector<32x128xf32> to vector<32x128xbf16>
    %cst_88 = arith.constant dense<0.000000e+00> : vector<64x128xf32>
    %128 = tpu.matmul %82, %127, %cst_88 {dimension_numbers = #tpu.dot_dimension_numbers<[1], [0], [0], [1], [0, 0, 1, 1], [], []>} : vector<64x32xbf16>, vector<32x128xbf16>, vector<64x128xf32> -> vector<64x128xf32>
    %cst_89 = arith.constant 0.000000e+00 : f32
    %129 = vector.broadcast %cst_89 : f32 to vector<64x128xf32>
    %130 = arith.maximumf %128, %129 : vector<64x128xf32>
    %131 = arith.maximumf %121, %130 : vector<64x128xf32>
    %c5_90 = arith.constant 5 : index
    %c0_91 = arith.constant 0 : index
    %c0_92 = arith.constant 0 : index
    %132 = vector.load %arg2[%c5_90, %c0_91, %c0_92] : memref<16x16x128xbf16, #tpu.memory_space<vmem>>, vector<1x16x128xbf16>
    %133 = vector.shape_cast %132 : vector<1x16x128xbf16> to vector<16x128xbf16>
    %cst_93 = arith.constant dense<0.000000e+00> : vector<32x128xf32>
    %134 = tpu.matmul %81, %133, %cst_93 {dimension_numbers = #tpu.dot_dimension_numbers<[1], [0], [0], [1], [0, 0, 1, 1], [], []>} : vector<32x16xbf16>, vector<16x128xbf16>, vector<32x128xf32> -> vector<32x128xf32>
    %cst_94 = arith.constant 0.000000e+00 : f32
    %135 = vector.broadcast %cst_94 : f32 to vector<32x128xf32>
    %136 = arith.maximumf %134, %135 : vector<32x128xf32>
    %137 = arith.truncf %136 : vector<32x128xf32> to vector<32x128xbf16>
    %cst_95 = arith.constant dense<0.000000e+00> : vector<64x128xf32>
    %138 = tpu.matmul %82, %137, %cst_95 {dimension_numbers = #tpu.dot_dimension_numbers<[1], [0], [0], [1], [0, 0, 1, 1], [], []>} : vector<64x32xbf16>, vector<32x128xbf16>, vector<64x128xf32> -> vector<64x128xf32>
    %cst_96 = arith.constant 0.000000e+00 : f32
    %139 = vector.broadcast %cst_96 : f32 to vector<64x128xf32>
    %140 = arith.maximumf %138, %139 : vector<64x128xf32>
    %141 = arith.maximumf %131, %140 : vector<64x128xf32>
    %c6_97 = arith.constant 6 : index
    %c0_98 = arith.constant 0 : index
    %c0_99 = arith.constant 0 : index
    %142 = vector.load %arg2[%c6_97, %c0_98, %c0_99] : memref<16x16x128xbf16, #tpu.memory_space<vmem>>, vector<1x16x128xbf16>
    %143 = vector.shape_cast %142 : vector<1x16x128xbf16> to vector<16x128xbf16>
    %cst_100 = arith.constant dense<0.000000e+00> : vector<32x128xf32>
    %144 = tpu.matmul %81, %143, %cst_100 {dimension_numbers = #tpu.dot_dimension_numbers<[1], [0], [0], [1], [0, 0, 1, 1], [], []>} : vector<32x16xbf16>, vector<16x128xbf16>, vector<32x128xf32> -> vector<32x128xf32>
    %cst_101 = arith.constant 0.000000e+00 : f32
    %145 = vector.broadcast %cst_101 : f32 to vector<32x128xf32>
    %146 = arith.maximumf %144, %145 : vector<32x128xf32>
    %147 = arith.truncf %146 : vector<32x128xf32> to vector<32x128xbf16>
    %cst_102 = arith.constant dense<0.000000e+00> : vector<64x128xf32>
    %148 = tpu.matmul %82, %147, %cst_102 {dimension_numbers = #tpu.dot_dimension_numbers<[1], [0], [0], [1], [0, 0, 1, 1], [], []>} : vector<64x32xbf16>, vector<32x128xbf16>, vector<64x128xf32> -> vector<64x128xf32>
    %cst_103 = arith.constant 0.000000e+00 : f32
    %149 = vector.broadcast %cst_103 : f32 to vector<64x128xf32>
    %150 = arith.maximumf %148, %149 : vector<64x128xf32>
    %151 = arith.maximumf %141, %150 : vector<64x128xf32>
    %c7_104 = arith.constant 7 : index
    %c0_105 = arith.constant 0 : index
    %c0_106 = arith.constant 0 : index
    %152 = vector.load %arg2[%c7_104, %c0_105, %c0_106] : memref<16x16x128xbf16, #tpu.memory_space<vmem>>, vector<1x16x128xbf16>
    %153 = vector.shape_cast %152 : vector<1x16x128xbf16> to vector<16x128xbf16>
    %cst_107 = arith.constant dense<0.000000e+00> : vector<32x128xf32>
    %154 = tpu.matmul %81, %153, %cst_107 {dimension_numbers = #tpu.dot_dimension_numbers<[1], [0], [0], [1], [0, 0, 1, 1], [], []>} : vector<32x16xbf16>, vector<16x128xbf16>, vector<32x128xf32> -> vector<32x128xf32>
    %cst_108 = arith.constant 0.000000e+00 : f32
    %155 = vector.broadcast %cst_108 : f32 to vector<32x128xf32>
    %156 = arith.maximumf %154, %155 : vector<32x128xf32>
    %157 = arith.truncf %156 : vector<32x128xf32> to vector<32x128xbf16>
    %cst_109 = arith.constant dense<0.000000e+00> : vector<64x128xf32>
    %158 = tpu.matmul %82, %157, %cst_109 {dimension_numbers = #tpu.dot_dimension_numbers<[1], [0], [0], [1], [0, 0, 1, 1], [], []>} : vector<64x32xbf16>, vector<32x128xbf16>, vector<64x128xf32> -> vector<64x128xf32>
    %cst_110 = arith.constant 0.000000e+00 : f32
    %159 = vector.broadcast %cst_110 : f32 to vector<64x128xf32>
    %160 = arith.maximumf %158, %159 : vector<64x128xf32>
    %161 = arith.maximumf %151, %160 : vector<64x128xf32>
    %c8 = arith.constant 8 : index
    %c0_111 = arith.constant 0 : index
    %c0_112 = arith.constant 0 : index
    %162 = vector.load %arg2[%c8, %c0_111, %c0_112] : memref<16x16x128xbf16, #tpu.memory_space<vmem>>, vector<1x16x128xbf16>
    %163 = vector.shape_cast %162 : vector<1x16x128xbf16> to vector<16x128xbf16>
    %cst_113 = arith.constant dense<0.000000e+00> : vector<32x128xf32>
    %164 = tpu.matmul %81, %163, %cst_113 {dimension_numbers = #tpu.dot_dimension_numbers<[1], [0], [0], [1], [0, 0, 1, 1], [], []>} : vector<32x16xbf16>, vector<16x128xbf16>, vector<32x128xf32> -> vector<32x128xf32>
    %cst_114 = arith.constant 0.000000e+00 : f32
    %165 = vector.broadcast %cst_114 : f32 to vector<32x128xf32>
    %166 = arith.maximumf %164, %165 : vector<32x128xf32>
    %167 = arith.truncf %166 : vector<32x128xf32> to vector<32x128xbf16>
    %cst_115 = arith.constant dense<0.000000e+00> : vector<64x128xf32>
    %168 = tpu.matmul %82, %167, %cst_115 {dimension_numbers = #tpu.dot_dimension_numbers<[1], [0], [0], [1], [0, 0, 1, 1], [], []>} : vector<64x32xbf16>, vector<32x128xbf16>, vector<64x128xf32> -> vector<64x128xf32>
    %cst_116 = arith.constant 0.000000e+00 : f32
    %169 = vector.broadcast %cst_116 : f32 to vector<64x128xf32>
    %170 = arith.maximumf %168, %169 : vector<64x128xf32>
    %171 = arith.maximumf %161, %170 : vector<64x128xf32>
    %c9 = arith.constant 9 : index
    %c0_117 = arith.constant 0 : index
    %c0_118 = arith.constant 0 : index
    %172 = vector.load %arg2[%c9, %c0_117, %c0_118] : memref<16x16x128xbf16, #tpu.memory_space<vmem>>, vector<1x16x128xbf16>
    %173 = vector.shape_cast %172 : vector<1x16x128xbf16> to vector<16x128xbf16>
    %cst_119 = arith.constant dense<0.000000e+00> : vector<32x128xf32>
    %174 = tpu.matmul %81, %173, %cst_119 {dimension_numbers = #tpu.dot_dimension_numbers<[1], [0], [0], [1], [0, 0, 1, 1], [], []>} : vector<32x16xbf16>, vector<16x128xbf16>, vector<32x128xf32> -> vector<32x128xf32>
    %cst_120 = arith.constant 0.000000e+00 : f32
    %175 = vector.broadcast %cst_120 : f32 to vector<32x128xf32>
    %176 = arith.maximumf %174, %175 : vector<32x128xf32>
    %177 = arith.truncf %176 : vector<32x128xf32> to vector<32x128xbf16>
    %cst_121 = arith.constant dense<0.000000e+00> : vector<64x128xf32>
    %178 = tpu.matmul %82, %177, %cst_121 {dimension_numbers = #tpu.dot_dimension_numbers<[1], [0], [0], [1], [0, 0, 1, 1], [], []>} : vector<64x32xbf16>, vector<32x128xbf16>, vector<64x128xf32> -> vector<64x128xf32>
    %cst_122 = arith.constant 0.000000e+00 : f32
    %179 = vector.broadcast %cst_122 : f32 to vector<64x128xf32>
    %180 = arith.maximumf %178, %179 : vector<64x128xf32>
    %181 = arith.maximumf %171, %180 : vector<64x128xf32>
    %c10 = arith.constant 10 : index
    %c0_123 = arith.constant 0 : index
    %c0_124 = arith.constant 0 : index
    %182 = vector.load %arg2[%c10, %c0_123, %c0_124] : memref<16x16x128xbf16, #tpu.memory_space<vmem>>, vector<1x16x128xbf16>
    %183 = vector.shape_cast %182 : vector<1x16x128xbf16> to vector<16x128xbf16>
    %cst_125 = arith.constant dense<0.000000e+00> : vector<32x128xf32>
    %184 = tpu.matmul %81, %183, %cst_125 {dimension_numbers = #tpu.dot_dimension_numbers<[1], [0], [0], [1], [0, 0, 1, 1], [], []>} : vector<32x16xbf16>, vector<16x128xbf16>, vector<32x128xf32> -> vector<32x128xf32>
    %cst_126 = arith.constant 0.000000e+00 : f32
    %185 = vector.broadcast %cst_126 : f32 to vector<32x128xf32>
    %186 = arith.maximumf %184, %185 : vector<32x128xf32>
    %187 = arith.truncf %186 : vector<32x128xf32> to vector<32x128xbf16>
    %cst_127 = arith.constant dense<0.000000e+00> : vector<64x128xf32>
    %188 = tpu.matmul %82, %187, %cst_127 {dimension_numbers = #tpu.dot_dimension_numbers<[1], [0], [0], [1], [0, 0, 1, 1], [], []>} : vector<64x32xbf16>, vector<32x128xbf16>, vector<64x128xf32> -> vector<64x128xf32>
    %cst_128 = arith.constant 0.000000e+00 : f32
    %189 = vector.broadcast %cst_128 : f32 to vector<64x128xf32>
    %190 = arith.maximumf %188, %189 : vector<64x128xf32>
    %191 = arith.maximumf %181, %190 : vector<64x128xf32>
    %c11 = arith.constant 11 : index
    %c0_129 = arith.constant 0 : index
    %c0_130 = arith.constant 0 : index
    %192 = vector.load %arg2[%c11, %c0_129, %c0_130] : memref<16x16x128xbf16, #tpu.memory_space<vmem>>, vector<1x16x128xbf16>
    %193 = vector.shape_cast %192 : vector<1x16x128xbf16> to vector<16x128xbf16>
    %cst_131 = arith.constant dense<0.000000e+00> : vector<32x128xf32>
    %194 = tpu.matmul %81, %193, %cst_131 {dimension_numbers = #tpu.dot_dimension_numbers<[1], [0], [0], [1], [0, 0, 1, 1], [], []>} : vector<32x16xbf16>, vector<16x128xbf16>, vector<32x128xf32> -> vector<32x128xf32>
    %cst_132 = arith.constant 0.000000e+00 : f32
    %195 = vector.broadcast %cst_132 : f32 to vector<32x128xf32>
    %196 = arith.maximumf %194, %195 : vector<32x128xf32>
    %197 = arith.truncf %196 : vector<32x128xf32> to vector<32x128xbf16>
    %cst_133 = arith.constant dense<0.000000e+00> : vector<64x128xf32>
    %198 = tpu.matmul %82, %197, %cst_133 {dimension_numbers = #tpu.dot_dimension_numbers<[1], [0], [0], [1], [0, 0, 1, 1], [], []>} : vector<64x32xbf16>, vector<32x128xbf16>, vector<64x128xf32> -> vector<64x128xf32>
    %cst_134 = arith.constant 0.000000e+00 : f32
    %199 = vector.broadcast %cst_134 : f32 to vector<64x128xf32>
    %200 = arith.maximumf %198, %199 : vector<64x128xf32>
    %201 = arith.maximumf %191, %200 : vector<64x128xf32>
    %c12 = arith.constant 12 : index
    %c0_135 = arith.constant 0 : index
    %c0_136 = arith.constant 0 : index
    %202 = vector.load %arg2[%c12, %c0_135, %c0_136] : memref<16x16x128xbf16, #tpu.memory_space<vmem>>, vector<1x16x128xbf16>
    %203 = vector.shape_cast %202 : vector<1x16x128xbf16> to vector<16x128xbf16>
    %cst_137 = arith.constant dense<0.000000e+00> : vector<32x128xf32>
    %204 = tpu.matmul %81, %203, %cst_137 {dimension_numbers = #tpu.dot_dimension_numbers<[1], [0], [0], [1], [0, 0, 1, 1], [], []>} : vector<32x16xbf16>, vector<16x128xbf16>, vector<32x128xf32> -> vector<32x128xf32>
    %cst_138 = arith.constant 0.000000e+00 : f32
    %205 = vector.broadcast %cst_138 : f32 to vector<32x128xf32>
    %206 = arith.maximumf %204, %205 : vector<32x128xf32>
    %207 = arith.truncf %206 : vector<32x128xf32> to vector<32x128xbf16>
    %cst_139 = arith.constant dense<0.000000e+00> : vector<64x128xf32>
    %208 = tpu.matmul %82, %207, %cst_139 {dimension_numbers = #tpu.dot_dimension_numbers<[1], [0], [0], [1], [0, 0, 1, 1], [], []>} : vector<64x32xbf16>, vector<32x128xbf16>, vector<64x128xf32> -> vector<64x128xf32>
    %cst_140 = arith.constant 0.000000e+00 : f32
    %209 = vector.broadcast %cst_140 : f32 to vector<64x128xf32>
    %210 = arith.maximumf %208, %209 : vector<64x128xf32>
    %211 = arith.maximumf %201, %210 : vector<64x128xf32>
    %c13 = arith.constant 13 : index
    %c0_141 = arith.constant 0 : index
    %c0_142 = arith.constant 0 : index
    %212 = vector.load %arg2[%c13, %c0_141, %c0_142] : memref<16x16x128xbf16, #tpu.memory_space<vmem>>, vector<1x16x128xbf16>
    %213 = vector.shape_cast %212 : vector<1x16x128xbf16> to vector<16x128xbf16>
    %cst_143 = arith.constant dense<0.000000e+00> : vector<32x128xf32>
    %214 = tpu.matmul %81, %213, %cst_143 {dimension_numbers = #tpu.dot_dimension_numbers<[1], [0], [0], [1], [0, 0, 1, 1], [], []>} : vector<32x16xbf16>, vector<16x128xbf16>, vector<32x128xf32> -> vector<32x128xf32>
    %cst_144 = arith.constant 0.000000e+00 : f32
    %215 = vector.broadcast %cst_144 : f32 to vector<32x128xf32>
    %216 = arith.maximumf %214, %215 : vector<32x128xf32>
    %217 = arith.truncf %216 : vector<32x128xf32> to vector<32x128xbf16>
    %cst_145 = arith.constant dense<0.000000e+00> : vector<64x128xf32>
    %218 = tpu.matmul %82, %217, %cst_145 {dimension_numbers = #tpu.dot_dimension_numbers<[1], [0], [0], [1], [0, 0, 1, 1], [], []>} : vector<64x32xbf16>, vector<32x128xbf16>, vector<64x128xf32> -> vector<64x128xf32>
    %cst_146 = arith.constant 0.000000e+00 : f32
    %219 = vector.broadcast %cst_146 : f32 to vector<64x128xf32>
    %220 = arith.maximumf %218, %219 : vector<64x128xf32>
    %221 = arith.maximumf %211, %220 : vector<64x128xf32>
    %c14 = arith.constant 14 : index
    %c0_147 = arith.constant 0 : index
    %c0_148 = arith.constant 0 : index
    %222 = vector.load %arg2[%c14, %c0_147, %c0_148] : memref<16x16x128xbf16, #tpu.memory_space<vmem>>, vector<1x16x128xbf16>
    %223 = vector.shape_cast %222 : vector<1x16x128xbf16> to vector<16x128xbf16>
    %cst_149 = arith.constant dense<0.000000e+00> : vector<32x128xf32>
    %224 = tpu.matmul %81, %223, %cst_149 {dimension_numbers = #tpu.dot_dimension_numbers<[1], [0], [0], [1], [0, 0, 1, 1], [], []>} : vector<32x16xbf16>, vector<16x128xbf16>, vector<32x128xf32> -> vector<32x128xf32>
    %cst_150 = arith.constant 0.000000e+00 : f32
    %225 = vector.broadcast %cst_150 : f32 to vector<32x128xf32>
    %226 = arith.maximumf %224, %225 : vector<32x128xf32>
    %227 = arith.truncf %226 : vector<32x128xf32> to vector<32x128xbf16>
    %cst_151 = arith.constant dense<0.000000e+00> : vector<64x128xf32>
    %228 = tpu.matmul %82, %227, %cst_151 {dimension_numbers = #tpu.dot_dimension_numbers<[1], [0], [0], [1], [0, 0, 1, 1], [], []>} : vector<64x32xbf16>, vector<32x128xbf16>, vector<64x128xf32> -> vector<64x128xf32>
    %cst_152 = arith.constant 0.000000e+00 : f32
    %229 = vector.broadcast %cst_152 : f32 to vector<64x128xf32>
    %230 = arith.maximumf %228, %229 : vector<64x128xf32>
    %231 = arith.maximumf %221, %230 : vector<64x128xf32>
    %c15 = arith.constant 15 : index
    %c0_153 = arith.constant 0 : index
    %c0_154 = arith.constant 0 : index
    %232 = vector.load %arg2[%c15, %c0_153, %c0_154] : memref<16x16x128xbf16, #tpu.memory_space<vmem>>, vector<1x16x128xbf16>
    %233 = vector.shape_cast %232 : vector<1x16x128xbf16> to vector<16x128xbf16>
    %cst_155 = arith.constant dense<0.000000e+00> : vector<32x128xf32>
    %234 = tpu.matmul %81, %233, %cst_155 {dimension_numbers = #tpu.dot_dimension_numbers<[1], [0], [0], [1], [0, 0, 1, 1], [], []>} : vector<32x16xbf16>, vector<16x128xbf16>, vector<32x128xf32> -> vector<32x128xf32>
    %cst_156 = arith.constant 0.000000e+00 : f32
    %235 = vector.broadcast %cst_156 : f32 to vector<32x128xf32>
    %236 = arith.maximumf %234, %235 : vector<32x128xf32>
    %237 = arith.truncf %236 : vector<32x128xf32> to vector<32x128xbf16>
    %cst_157 = arith.constant dense<0.000000e+00> : vector<64x128xf32>
    %238 = tpu.matmul %82, %237, %cst_157 {dimension_numbers = #tpu.dot_dimension_numbers<[1], [0], [0], [1], [0, 0, 1, 1], [], []>} : vector<64x32xbf16>, vector<32x128xbf16>, vector<64x128xf32> -> vector<64x128xf32>
    %cst_158 = arith.constant 0.000000e+00 : f32
    %239 = vector.broadcast %cst_158 : f32 to vector<64x128xf32>
    %240 = arith.maximumf %238, %239 : vector<64x128xf32>
    %241 = arith.maximumf %231, %240 : vector<64x128xf32>
    %242 = tpu.concatenate %80, %241 in 0 : vector<64x128xf32>, vector<64x128xf32> -> vector<128x128xf32>
    %243 = tpu.transpose %242, [1, 0] : vector<128x128xf32> -> vector<128x128xf32>
    %c0_159 = arith.constant 0 : index
    %c0_160 = arith.constant 0 : index
    %244 = vector.load %arg7[%c0_159, %c0_160] : memref<128x128xf32, #tpu.memory_space<vmem>>, vector<128x128xf32>
    tpu.vector_store %arg7[%c0_159, %c0_160], %243 {strides = array<i32>} : memref<128x128xf32, #tpu.memory_space<vmem>>, vector<128x128xf32>,
    return
  }
  func.func @transform_0(%arg0: i32) -> (i32, i32, i32) {
    %c0_i32 = arith.constant 0 : i32
    %c0_i32_0 = arith.constant 0 : i32
    %c0_i32_1 = arith.constant 0 : i32
    return %c0_i32, %c0_i32_0, %arg0 : i32, i32, i32
  }
  func.func @transform_1(%arg0: i32) -> (i32, i32, i32) {
    %c0_i32 = arith.constant 0 : i32
    %c0_i32_0 = arith.constant 0 : i32
    %c0_i32_1 = arith.constant 0 : i32
    return %c0_i32, %c0_i32_0, %arg0 : i32, i32, i32
  }
  func.func @transform_2(%arg0: i32) -> (i32, i32) {
    %c0_i32 = arith.constant 0 : i32
    %c0_i32_0 = arith.constant 0 : i32
    %c0_i32_1 = arith.constant 0 : i32
    return %c0_i32, %c0_i32_0 : i32, i32
  }
  func.func @transform_3(%arg0: i32) -> (i32, i32) {
    %c0_i32 = arith.constant 0 : i32
    %c0_i32_0 = arith.constant 0 : i32
    %c0_i32_1 = arith.constant 0 : i32
    return %c0_i32, %c0_i32_0 : i32, i32
  }
  func.func @transform_4(%arg0: i32) -> (i32, i32) {
    %c0_i32 = arith.constant 0 : i32
    %c0_i32_0 = arith.constant 0 : i32
    %c0_i32_1 = arith.constant 0 : i32
    return %c0_i32, %c0_i32_0 : i32, i32
  }
  func.func @transform_5(%arg0: i32) -> (i32, i32) {
    %c0_i32 = arith.constant 0 : i32
    %c0_i32_0 = arith.constant 0 : i32
    %c0_i32_1 = arith.constant 0 : i32
    return %c0_i32, %c0_i32_0 : i32, i32
  }
  func.func @transform_6(%arg0: i32) -> (i32, i32) {
    %c0_i32 = arith.constant 0 : i32
    %c0_i32_0 = arith.constant 0 : i32
    return %arg0, %c0_i32 : i32, i32
  }
}

</mosaic_0001>

<bundles_post_ra>
// kernel: tpu_custom_call.1
= control target key start
LH: loop header
LB: loop body
LE: loop exit
PB: predicated region body
PF: predicated region fallthrough
CT: control target
= control target key end

     0   :  { %s3974_s0 = inlined_call_operand.hbm [shape: bf16[8,16,512], index: 0, kind: input, shape index: {}]   ;;  %s3975_s1 = inlined_call_operand.hbm [shape: bf16[16,16,512], index: 1, kind: input, shape index: {}]   ;;  %s3976_s2 = inlined_call_operand.vmem [shape: bf16[32,16], index: 2, kind: input, shape index: {}]   ;;  %s3977_s3 = inlined_call_operand.vmem [shape: bf16[64,32], index: 3, kind: input, shape index: {}]   ;;  %s3978_s4 = inlined_call_operand.vmem [shape: bf16[32,16], index: 4, kind: input, shape index: {}]   ;;  %s3979_s5 = inlined_call_operand.vmem [shape: bf16[64,32], index: 5, kind: input, shape index: {}]   ;;  %s3980_s6 = inlined_call_operand.hbm [shape: f32[512,128], index: 6, kind: output, shape index: {}]  }
   0x1   :  { %3986 = sst [smem:[#allocation15_spill]] %s3974_s0 }
   0x2   :  { %11 = vsyncpa [#allocation3], 0 }
   0x3   :  { %13 = vsyncpa [#allocation3 + $0x1], 0 }
   0x4   :  { %14 = vsyncpa [#allocation6], 0 }
   0x5   :  { %16 = vsyncpa [#allocation6 + $0x1], 0 }
   0x6   :  { %17 = vsyncpa [#allocation4], 0 }
   0x7   :  { %19 = vsyncpa [#allocation4 + $0x1], 0  ;;  %s3093_s21 = smov 0   ;;  %s3095_s22 = smov 0  }
   0x8   :  { %s3097_s23 = smov 0   ;;  %s3099_s24 = smov 0  }
   0x9 LB: > { %3987 = sst [smem:[#allocation11_spill]] %s3047_s23  ;;  %s3114_s25 = sadd.s32 4294967295, %s3051_s24   ;;  %s3051_s24 = sphi %s3099_s24, %s4000_s24   ;;  %s3047_s23 = sphi %s3097_s23, %s4002_s23   ;;  %s3043_s22 = sphi %s3095_s22, %s4004_s22   ;;  %s3039_s21 = sphi %s3093_s21, %s4003_s21  }
   0xa   : > { %s2474_s26 = sadd.s32 4294967294, %s3051_s24   ;;  %s3118_s27 = sadd.s32 1, %s3051_s24  }
   0xb   : > { %3988 = sst [smem:[#allocation12_spill]] %s3118_s27  ;;  %s32_s28 = sadd.s32 1, %s3047_s23 }
   0xc   : > { %s29_s29 = ssub.s32 %s3051_s24, %s3118_s27  ;;  %p39_p0 = scmp.ne.s32.totalorder %s3047_s23, %s3043_s22 }
   0xd   : > { %p30_p1 = scmp.eq.s32.totalorder %s29_s29, 0  ;;  %p40_p2 = scmp.eq.s32.totalorder %s3051_s24, 0 }
   0xe   : > { %p45_p3 = scmp.ne.s32.totalorder %s3043_s22, %s3039_s21  ;;  %p46_p4 = scmp.eq.s32.totalorder %s3114_s25, 0 }
   0xf   : > { %s3130_s30 = scalar_select %p30_p1, %s3047_s23, %s32_s28  }
  0x10   : > { %p3132_p5 = por %p40_p2, %p39_p0  ;;  %p3136_p6 = por %p46_p4, %p45_p3 }
  0x11   : > { %3989 = sst [smem:[#allocation13_spill]] %s3130_s30  ;;  %p179_p7 = scmp.eq.s32.totalorder %s3114_s25, 3 }
  0x12   : > { %p185_p8 = scmp.eq.s32.totalorder %s2474_s26, 3  ;;  %p2876_p9 = scmp.lt.s32.totalorder %s3051_s24, 4 }
  0x13   : > { %p3142_p10 = por %p179_p7, %p39_p0  ;;  %s3151_s11 = sand.u32 1, %s3047_s23  }
  0x14   : > { %p3146_p11 = por %p185_p8, %p45_p3  ;;  %s3981_s12 = sshll.u32 %s3051_s24, 2 }
  0x15   : > { %s2477_s13 = sshll.u32 %s3151_s11, 6  ;;  %s3995_s0 = sld [smem:[#allocation15_spill]] }
  0x16   : > { %s3993_s10 = scalar_select %p3146_p11, 1, 0 }
  0x17   : > { %s221_s18 = scalar_lea.vmem [#allocation2], %s2477_s13  ;;  %p3162_p12 = pnand %p2876_p9, %p3132_p5 }
  0x18   : > { %3994 = sst [smem:[#allocation14_spill]] %s3993_s10  ;;  %s228_s19 = sshll.u32 %s221_s18, 4  ;;  %s229_s19 = int_to_ptr.vmem [resolvable:$true] %s228_s19 }
  0x19   : > { %p2481_p13 = scmp.ge.s32.totalorder %s3051_s24, 1  ;;  %s218_s26 = scalar_lea.sflag [#allocation3], %s3151_s11 }
  0x1a   : > { %p2925_p1 = pneg %p3162_p12 }
  0x1b   : > { %s225_s16 = scalar_lea.hbm %s3995_s0, %s3981_s12  ;;  %s2928_s14 = scalar_lea.hbm %s3995_s0, 256 }
  0x1c   : > { %s226_s17 = sshll.u32 %s225_s16, 4  ;;  %s227_s17 = int_to_ptr.hbm [resolvable:$true] %s226_s17 }
  0x1d   : > { %s2921_s28 = sshra.s32 %s227_s17, 4  ;;  %s2922_s28 = int_to_ptr.hbm [resolvable:$true] %s2921_s28 }
  0x1e   : > { %s2923_s29 = scalar_lea.hbm %s2922_s28, 64  ;;  %p2929_p4 = scmp.lt.s32.totalorder %s2922_s28, %s3995_s0 }
  0x1f   : > { %p2924_p0 = scmp.ne.s32.totalorder %s2922_s28, %s2923_s29  ;;  %p2930_p5 = scmp.lt.s32.totalorder %s2928_s14, %s2923_s29 }
  0x21   : > { %p2926_p2 = pnand %p2925_p1, %p2924_p0  ;;  %p2931_p7 = por %p2930_p5, %p2929_p4 }
  0x23   : > { %p2927_p3 = pneg %p2926_p2 }
  0x25   : > { %p2932_p8 = pnand %p2931_p7, %p2927_p3 }
  0x27   : > { %2935 = shalt.err (!%p2932_p8)
}
  0x28   : > { %s3053_s18 = smov 256   ;;  %s3054_s12 = smov 64  }
  0x29   : > { %s3055_s30 = smov 4   ;;  %p257_p9 = scmp.lt.s32.totalorder %s3051_s24, 5 }
  0x2a   : > { %2868 = dma.hbm_to_vmem [thread:$0]  (!%p3162_p12), %s227_s17, 1024, %s229_s19, %s218_s26, %s3053_s18, %s3054_s12, %s3055_s30  }
  0x2b   : > { %s2479_s28 = sshll.u32 %s3151_s11, 7  ;;  %s3997_s29 = sshll.u32 %s3051_s24, 2 }
  0x2c   : > { %s246_s14 = scalar_lea.hbm %s3975_s1, %s3997_s29  ;;  %p3192_p0 = pnand %p2481_p13, %p257_p9 }
  0x2d   : > { %s247_s16 = sshll.u32 %s246_s14, 4  ;;  %s242_s0 = scalar_lea.vmem [#allocation5], %s2479_s28  ;;  %s248_s16 = int_to_ptr.hbm [resolvable:$true] %s247_s16 }
  0x2e   : > { %s249_s23 = sshll.u32 %s242_s0, 4  ;;  %s239_s27 = scalar_lea.sflag [#allocation6], %s3151_s11  ;;  %s250_s23 = int_to_ptr.vmem [resolvable:$true] %s249_s23 }
  0x2f   : > { %s2951_s10 = sshra.s32 %s248_s16, 4  ;;  %s2958_s29 = scalar_lea.hbm %s3975_s1, 512  ;;  %s2952_s10 = int_to_ptr.hbm [resolvable:$true] %s2951_s10 }
  0x30   : > { %s2953_s17 = scalar_lea.hbm %s2952_s10, 128  ;;  %p2959_p13 = scmp.lt.s32.totalorder %s2952_s10, %s3975_s1 }
  0x31   : > { %p2954_p2 = scmp.ne.s32.totalorder %s2952_s10, %s2953_s17  ;;  %p2960_p5 = scmp.lt.s32.totalorder %s2958_s29, %s2953_s17 }
  0x33   : > { %p2956_p3 = pnand %p2954_p2, %p2925_p1  ;;  %p2961_p7 = por %p2960_p5, %p2959_p13 }
  0x35   : > { %p2957_p4 = pneg %p2956_p3 }
  0x37   : > { %p2962_p8 = pnand %p2961_p7, %p2957_p4 }
  0x39   : > { %2965 = shalt.err (!%p2962_p8)
}
  0x3a   : > { %2871 = dma.hbm_to_vmem [thread:$0]  (!%p3162_p12), %s248_s16, 2048, %s250_s23, %s239_s27, %s3053_s18, %s3054_s12, %s3055_s30  }
  0x3b   : > { %261 = sbr.rel (%p3192_p0) target bundleno = 2225 (0x8b1), region = 44  ;;  %s3213_s0 = sand.u32 (!%p3192_p0), 1, %s3043_s22  }
  0x3c   : > { %s2482_s11 = sshll.u32 (!%p3192_p0), %s3213_s0, 6  ;;  %s264_s10 = scalar_lea.sflag (!%p3192_p0), [#allocation3], %s3213_s0 }
  0x3d   : > { %s3217_s28 = scalar_lea.vmem (!%p3192_p0), [#allocation2], %s2482_s11 }
  0x40   : > { %3026 = dma.done.wait (%p3136_p6), %s264_s10, 1024  }
  0x41   : > { %3028 = vsyncadd (%p3136_p6), %s264_s10, 4294966272  ;;  %s2483_s23 = sshll.u32 %s3213_s0, 7  ;;  %s274_s27 = scalar_lea.sflag [#allocation6], %s3213_s0 }
  0x42   : > { %s3227_s30 = scalar_lea.vmem [#allocation5], %s2483_s23 }
  0x43   : > { %3030 = dma.done.wait (%p3136_p6), %s274_s27, 2048  }
  0x44   : > { %3032 = vsyncadd (%p3136_p6), %s274_s27, 4294965248  ;;  %v2828_v0 = vld [vmem:[%s3217_s28] sm:$0xff]  ;;  %v2829_v1 = vld [vmem:[%s3217_s28 + $0x8] sm:$0xff]  ;;  %vm344_vm0 = vcmask 130048   ;;  %vm396_vm1 = vcmask 261120   ;;  %s3923_s20 = scalar_lea.vmem [#allocation7], %s2483_s23 }
  0x45   : > { %v3238_v2 = vld [vmem:[%s3976_s2] sm:$0xff]  ;;  %v2830_v3 = vld [vmem:[%s3217_s28 + $0x10] sm:$0xff]  ;;  %358 = vmatpush.bf16.msra.mxu0 %v2828_v0  ;;  %462 = vmatpush.bf16.msra.mxu3 %v2829_v1  ;;  %v3248_v4 = vld [vmem:[%s3976_s2 + $0x8] sm:$0xff]  ;;  %s2858_s23 = sshll.u32 %s3114_s25, 7  ;;  %s2375_s15 = sshll.u32 %s3923_s20, 4  ;;  %s2376_s15 = int_to_ptr.vmem [resolvable:$true] %s2375_s15 }
  0x46   : > { %v2831_v5 = vld [vmem:[%s3217_s28 + $0x18] sm:$0xff]  ;;  %v3266_v25 = vld [vmem:[%s3977_s3] sm:$0xff]  ;;  %v3275_v30 = vld [vmem:[%s3977_s3 + $0x8] sm:$0xff]  ;;  %s2374_s14 = scalar_lea.hbm %s3980_s6, %s2858_s23  ;;  %s2363_s17 = scalar_lea.sflag [#allocation4], %s3213_s0 }
  0x47   : > { %v2833_v37 = vld [vmem:[%s3217_s28 + $0x28] sm:$0xff]  ;;  %v3285_v40 = vld [vmem:[%s3977_s3 + $0x10] sm:$0xff]  ;;  %v2832_v41 = vld [vmem:[%s3217_s28 + $0x20] sm:$0xff]  ;;  %s2377_s16 = sshll.u32 %s2374_s14, 4  ;;  %s3001_s13 = scalar_lea.hbm %s3980_s6, 512  ;;  %s2378_s16 = int_to_ptr.hbm [resolvable:$true] %s2377_s16 }
  0x48   : > { %2497 = vmatmul.msk.bf16.vlgmr.msra.gmra.mxu0 %vm344_vm0, %v3238_v2  ;;  %2525 = vmatmul.msk.bf16.vlgmr.msra.gmra.mxu3 %vm344_vm0, %v3238_v2  ;;  %v3297_v44 = vld [vmem:[%s3977_s3 + $0x18] sm:$0xff]  ;;  %v2834_v52 = vld [vmem:[%s3217_s28 + $0x30] sm:$0xff]  ;;  %s2995_s19 = sshra.s32 %s2378_s16, 4  ;;  %s2996_s19 = int_to_ptr.hbm [resolvable:$true] %s2995_s19 }
  0x49   : > { %541 = vmatpush.bf16.msrb.mxu0 %v2830_v3  ;;  %s2997_s26 = scalar_lea.hbm %s2996_s19, 128  ;;  %p3002_p9 = scmp.lt.s32.totalorder %s2996_s19, %s3980_s6 }
  0x4a   : > { %p2998_p6 = scmp.ne.s32.totalorder %s2996_s19, %s2997_s26  ;;  %p3003_p0 = scmp.lt.s32.totalorder %s3001_s13, %s2997_s26 }
  0x4c   : > { %p2999_p12 = pnand %p2998_p6, %p3142_p10  ;;  %p3004_p2 = por %p3003_p0, %p3002_p9 }
  0x4d   : > { %620 = vmatpush.bf16.msra.mxu0 %v2831_v5 }
  0x4e   : > { %p3000_p1 = pneg %p2999_p12 }
  0x50   : > { %p3005_p3 = pnand %p3004_p2, %p3000_p1 }
  0x58   : > { %2498 = vmatmul.msk.bf16.gmra.mxu0 %vm344_vm0, %v3248_v4  ;;  %2526 = vmatmul.msk.bf16.gmra.mxu3 %vm344_vm0, %v3248_v4 }
  0x68   : > { %2537 = vmatmul.msk.bf16.vlgmr.msrb.gmra.mxu0 %vm344_vm0, %v3238_v2 }
  0x78   : > { %2538 = vmatmul.msk.bf16.gmra.mxu0 %vm344_vm0, %v3248_v4 }
  0x88   : > { %2549 = vmatmul.msk.bf16.vlgmr.msra.gmra.mxu0 %vm344_vm0, %v3238_v2 }
  0x98   : > { %2550 = vmatmul.msk.bf16.gmra.mxu0 %vm344_vm0, %v3248_v4 }
  0xc5   : > { %v360_v6 = vpop.f32.mrf.mxu0 }
  0xc6   : > { %v370_v17 = vmax.f32 %v360_v6, 0.0 }
  0xcb   : > { %v464_v7 = vpop.f32.mrf.mxu3 }
  0xcc   : > { %v474_v20 = vmax.f32 %v464_v7, 0.0 }
  0xcd   : > { %v362_v8 = vpop.f32.mrf.mxu0 }
  0xce   : > { %v371_v15 = vmax.f32 %v362_v8, 0.0 }
  0xd0   : > { %v374_v23 = vpack.c.bf16 %v371_v15, %v370_v17 }
  0xd3   : > { %v466_v9 = vpop.f32.mrf.mxu3 }
  0xd4   : > { %v475_v21 = vmax.f32 %v466_v9, 0.0 }
  0xd5   : > { %v365_v10 = vpop.f32.mrf.mxu0 }
  0xd6   : > { %v372_v13 = vmax.f32 %v365_v10, 0.0  ;;  %v478_v27 = vpack.c.bf16 %v475_v21, %v474_v20 }
  0xdb   : > { %v469_v11 = vpop.f32.mrf.mxu3 }
  0xdc   : > { %v476_v18 = vmax.f32 %v469_v11, 0.0 }
  0xdd   : > { %v367_v12 = vpop.f32.mrf.mxu0 }
  0xde   : > { %v373_v14 = vmax.f32 %v367_v12, 0.0 }
  0xe0   : > { %v375_v16 = vpack.c.bf16 %v373_v14, %v372_v13 }
  0xe2   : > { %415 = vmatpush.bf16.msra.mxu1 %v375_v16 }
  0xe3   : > { %v471_v19 = vpop.f32.mrf.mxu3 }
  0xe4   : > { %v477_v22 = vmax.f32 %v471_v19, 0.0 }
  0xe5   : > { %v543_v24 = vpop.f32.mrf.mxu0 }
  0xe6   : > { %416 = vmatpush.bf16.msra.mxu1 %v374_v23  ;;  %v479_v26 = vpack.c.bf16 %v477_v22, %v476_v18  ;;  %v553_v36 = vmax.f32 %v543_v24, 0.0 }
  0xe8   : > { %486 = vmatpush.bf16.msrb.mxu3 %v479_v26 }
  0xe9   : > { %2515 = vmatmul.msk.bf16.vlgmr.msra.gmra.mxu1 %vm396_vm1, %v3266_v25 }
  0xec   : > { %487 = vmatpush.bf16.msrb.mxu3 %v478_v27 }
  0xed   : > { %v545_v28 = vpop.f32.mrf.mxu0 }
  0xee   : > { %v554_v34 = vmax.f32 %v545_v28, 0.0 }
  0xef   : > { %2527 = vmatmul.msk.bf16.vlgmr.msrb.gmra.mxu3 %vm396_vm1, %v3266_v25 }
  0xf0   : > { %v557_v38 = vpack.c.bf16 %v554_v34, %v553_v36  ;;  %699 = vmatpush.bf16.msra.mxu3 %v2832_v41 }
  0xf5   : > { %v548_v29 = vpop.f32.mrf.mxu0 }
  0xf6   : > { %v555_v32 = vmax.f32 %v548_v29, 0.0 }
  0xf9   : > { %2516 = vmatmul.msk.bf16.gmra.mxu1 %vm396_vm1, %v3275_v30 }
  0xfd   : > { %v550_v31 = vpop.f32.mrf.mxu0 }
  0xfe   : > { %v556_v33 = vmax.f32 %v550_v31, 0.0 }
  0xff   : > { %2528 = vmatmul.msk.bf16.gmra.mxu3 %vm396_vm1, %v3275_v30 }
 0x100   : > { %v558_v35 = vpack.c.bf16 %v556_v33, %v555_v32 }
 0x102   : > { %565 = vmatpush.bf16.msra.mxu2 %v558_v35 }
 0x105   : > { %v622_v39 = vpop.f32.mrf.mxu0 }
 0x106   : > { %566 = vmatpush.bf16.msra.mxu2 %v557_v38  ;;  %v632_v47 = vmax.f32 %v622_v39, 0.0 }
 0x109   : > { %2517 = vmatmul.msk.bf16.gmra.mxu1 %vm396_vm1, %v3285_v40  ;;  %2539 = vmatmul.msk.bf16.vlgmr.msra.gmra.mxu2 %vm396_vm1, %v3266_v25 }
 0x10a   : > { %778 = vmatpush.bf16.msrb.mxu2 %v2833_v37 }
 0x10d   : > { %v624_v42 = vpop.f32.mrf.mxu0 }
 0x10e   : > { %v633_v48 = vmax.f32 %v624_v42, 0.0  ;;  %857 = vmatpush.bf16.msra.mxu2 %v2834_v52 }
 0x10f   : > { %2529 = vmatmul.msk.bf16.gmra.mxu3 %vm396_vm1, %v3285_v40 }
 0x110   : > { %v636_v51 = vpack.c.bf16 %v633_v48, %v632_v47 }
 0x115   : > { %v627_v43 = vpop.f32.mrf.mxu0 }
 0x116   : > { %v634_v45 = vmax.f32 %v627_v43, 0.0 }
 0x119   : > { %2518 = vmatmul.msk.bf16.gmra.mxu1 %vm396_vm1, %v3297_v44  ;;  %2540 = vmatmul.msk.bf16.gmra.mxu2 %vm396_vm1, %v3275_v30 }
 0x11d   : > { %v629_v46 = vpop.f32.mrf.mxu0 }
 0x11e   : > { %v635_v49 = vmax.f32 %v629_v46, 0.0 }
 0x11f   : > { %2530 = vmatmul.msk.bf16.gmra.mxu3 %vm396_vm1, %v3297_v44 }
 0x120   : > { %v637_v50 = vpack.c.bf16 %v635_v49, %v634_v45 }
 0x122   : > { %644 = vmatpush.bf16.msrb.mxu1 %v637_v50 }
 0x126   : > { %645 = vmatpush.bf16.msrb.mxu1 %v636_v51 }
 0x129   : > { %2541 = vmatmul.msk.bf16.gmra.mxu2 %vm396_vm1, %v3285_v40  ;;  %2551 = vmatmul.msk.bf16.vlgmr.msrb.gmra.mxu1 %vm396_vm1, %v3266_v25 }
 0x12f   : > { %2561 = vmatmul.msk.bf16.vlgmr.msra.gmra.mxu3 %vm344_vm0, %v3238_v2 }
 0x139   : > { %2542 = vmatmul.msk.bf16.gmra.mxu2 %vm396_vm1, %v3297_v44  ;;  %2552 = vmatmul.msk.bf16.gmra.mxu1 %vm396_vm1, %v3275_v30 }
 0x13f   : > { %2562 = vmatmul.msk.bf16.gmra.mxu3 %vm344_vm0, %v3248_v4 }
 0x149   : > { %2553 = vmatmul.msk.bf16.gmra.mxu1 %vm396_vm1, %v3285_v40  ;;  %2573 = vmatmul.msk.bf16.vlgmr.msrb.gmra.mxu2 %vm344_vm0, %v3238_v2 }
 0x159   : > { %2554 = vmatmul.msk.bf16.gmra.mxu1 %vm396_vm1, %v3297_v44  ;;  %2574 = vmatmul.msk.bf16.gmra.mxu2 %vm344_vm0, %v3248_v4 }
 0x166   : > { %v418_v53 = vpop.f32.mrf.mxu1 }
 0x167   : > { %v438_v55 = vmax.f32 %v418_v53, 0.0 }
 0x169   : > { %2585 = vmatmul.msk.bf16.vlgmr.msra.gmra.mxu2 %vm344_vm0, %v3238_v2 }
 0x16e   : > { %v3328_v54 = vpop.f32.mrf.mxu1 }
 0x172   : > { %v489_v56 = vpop.f32.mrf.mxu3 }
 0x173   : > { %v509_v57 = vmax.f32 %v489_v56, 0.0 }
 0x175   : > { %v517_v58 = vmax.f32 %v438_v55, %v509_v57 }
 0x176   : > { %v423_v59 = vpop.f32.mrf.mxu1 }
 0x177   : > { %v440_v62 = vmax.f32 %v423_v59, 0.0 }
 0x179   : > { %2586 = vmatmul.msk.bf16.gmra.mxu2 %vm344_vm0, %v3248_v4 }
 0x17a   : > { %v3332_v60 = vpop.f32.mrf.mxu3 }
 0x17e   : > { %v3334_v61 = vpop.f32.mrf.mxu1 }
 0x182   : > { %v494_v63 = vpop.f32.mrf.mxu3 }
 0x183   : > { %v511_v0 = vmax.f32 %v494_v63, 0.0 }
 0x185   : > { %v519_v1 = vmax.f32 %v440_v62, %v511_v0 }
 0x186   : > { %v428_v3 = vpop.f32.mrf.mxu1 }
 0x187   : > { %v442_v10 = vmax.f32 %v428_v3, 0.0 }
 0x18a   : > { %v3336_v5 = vpop.f32.mrf.mxu3 }
 0x18c   : > { %v568_v6 = vpop.f32.mrf.mxu2 }
 0x18d   : > { %v588_v7 = vmax.f32 %v568_v6, 0.0 }
 0x18e   : > { %v3338_v8 = vpop.f32.mrf.mxu1 }
 0x18f   : > { %v596_v9 = vmax.f32 %v517_v58, %v588_v7 }
 0x192   : > { %v499_v11 = vpop.f32.mrf.mxu3 }
 0x193   : > { %v513_v12 = vmax.f32 %v499_v11, 0.0 }
 0x194   : > { %v3340_v13 = vpop.f32.mrf.mxu2 }
 0x195   : > { %v521_v14 = vmax.f32 %v442_v10, %v513_v12 }
 0x196   : > { %v433_v15 = vpop.f32.mrf.mxu1 }
 0x197   : > { %v444_v21 = vmax.f32 %v433_v15, 0.0 }
 0x19a   : > { %v3342_v16 = vpop.f32.mrf.mxu3 }
 0x19c   : > { %v573_v17 = vpop.f32.mrf.mxu2 }
 0x19d   : > { %v590_v18 = vmax.f32 %v573_v17, 0.0 }
 0x19e   : > { %v3344_v19 = vpop.f32.mrf.mxu1 }
 0x19f   : > { %v598_v20 = vmax.f32 %v519_v1, %v590_v18  ;;  %v2842_v18 = vld [vmem:[%s3227_s30] sm:$0xff] }
 0x1a2   : > { %v504_v22 = vpop.f32.mrf.mxu3 }
 0x1a3   : > { %v515_v23 = vmax.f32 %v504_v22, 0.0  ;;  %v2835_v22 = vld [vmem:[%s3217_s28 + $0x38] sm:$0xff] }
 0x1a4   : > { %v3346_v24 = vpop.f32.mrf.mxu2 }
 0x1a5   : > { %v523_v26 = vmax.f32 %v444_v21, %v515_v23 }
 0x1a6   : > { %v647_v27 = vpop.f32.mrf.mxu1 }
 0x1a7   : > { %v667_v28 = vmax.f32 %v647_v27, 0.0 }
 0x1a9   : > { %v3348_v29 = vmax.f32 %v596_v9, %v667_v28 }
 0x1aa   : > { %v3350_v31 = vpop.f32.mrf.mxu3 }
 0x1ac   : > { %v578_v32 = vpop.f32.mrf.mxu2 }
 0x1ad   : > { %v592_v33 = vmax.f32 %v578_v32, 0.0 }
 0x1ae   : > { %v3352_v34 = vpop.f32.mrf.mxu1 }
 0x1af   : > { %v600_v35 = vmax.f32 %v521_v14, %v592_v33 }
 0x1b2   : > { %v701_v36 = vpop.f32.mrf.mxu3 }
 0x1b3   : > { %v711_v56 = vmax.f32 %v701_v36, 0.0 }
 0x1b4   : > { %v3354_v37 = vpop.f32.mrf.mxu2 }
 0x1b6   : > { %v652_v38 = vpop.f32.mrf.mxu1 }
 0x1b7   : > { %v669_v39 = vmax.f32 %v652_v38, 0.0 }
 0x1b9   : > { %v3356_v41 = vmax.f32 %v598_v20, %v669_v39  ;;  %v2843_v39 = vld [vmem:[%s3227_s30 + $0x8] sm:$0xff] }
 0x1ba   : > { %v703_v42 = vpop.f32.mrf.mxu3 }
 0x1bb   : > { %v712_v57 = vmax.f32 %v703_v42, 0.0  ;;  %v3398_v42 = vld [vmem:[%s3978_s4] sm:$0xff] }
 0x1bc   : > { %v583_v43 = vpop.f32.mrf.mxu2 }
 0x1bd   : > { %v594_v45 = vmax.f32 %v583_v43, 0.0  ;;  %v715_v0 = vpack.c.bf16 %v712_v57, %v711_v56 }
 0x1be   : > { %v3358_v46 = vpop.f32.mrf.mxu1 }
 0x1bf   : > { %v602_v47 = vmax.f32 %v523_v26, %v594_v45 }
 0x1c2   : > { %v706_v48 = vpop.f32.mrf.mxu3 }
 0x1c3   : > { %v713_v52 = vmax.f32 %v706_v48, 0.0 }
 0x1c4   : > { %v3360_v49 = vpop.f32.mrf.mxu2 }
 0x1c6   : > { %v657_v50 = vpop.f32.mrf.mxu1 }
 0x1c7   : > { %v671_v51 = vmax.f32 %v657_v50, 0.0 }
 0x1c9   : > { %v3362_v53 = vmax.f32 %v600_v35, %v671_v51 }
 0x1ca   : > { %v708_v55 = vpop.f32.mrf.mxu3 }
 0x1cb   : > { %v714_v58 = vmax.f32 %v708_v55, 0.0 }
 0x1cc   : > { %v780_v59 = vpop.f32.mrf.mxu2 }
 0x1cd   : > { %v716_v62 = vpack.c.bf16 %v714_v58, %v713_v52  ;;  %v790_v17 = vmax.f32 %v780_v59, 0.0 }
 0x1ce   : > { %v3364_v63 = vpop.f32.mrf.mxu1 }
 0x1cf   : > { %723 = vmatpush.bf16.msrb.mxu0 %v716_v62 }
 0x1d3   : > { %724 = vmatpush.bf16.msrb.mxu0 %v715_v0 }
 0x1d4   : > { %v782_v1 = vpop.f32.mrf.mxu2 }
 0x1d5   : > { %v791_v14 = vmax.f32 %v782_v1, 0.0 }
 0x1d6   : > { %v662_v3 = vpop.f32.mrf.mxu1  ;;  %2563 = vmatmul.msk.bf16.vlgmr.msrb.gmra.mxu0 %vm396_vm1, %v3266_v25 }
 0x1d7   : > { %v673_v6 = vmax.f32 %v662_v3, 0.0  ;;  %v794_v20 = vpack.c.bf16 %v791_v14, %v790_v17  ;;  %936 = vmatpush.bf16.msra.mxu0 %v2835_v22 }
 0x1d9   : > { %v3368_v7 = vmax.f32 %v602_v47, %v673_v6 }
 0x1dc   : > { %v785_v9 = vpop.f32.mrf.mxu2 }
 0x1dd   : > { %v792_v11 = vmax.f32 %v785_v9, 0.0 }
 0x1e4   : > { %v787_v10 = vpop.f32.mrf.mxu2 }
 0x1e5   : > { %v793_v12 = vmax.f32 %v787_v10, 0.0  ;;  %v3428_v10 = vpop.f32.mrf.mxu1 }
 0x1e6   : > { %2564 = vmatmul.msk.bf16.gmra.mxu0 %vm396_vm1, %v3275_v30 }
 0x1e7   : > { %v795_v15 = vpack.c.bf16 %v793_v12, %v792_v11 }
 0x1e9   : > { %802 = vmatpush.bf16.msrb.mxu3 %v795_v15 }
 0x1ec   : > { %v859_v21 = vpop.f32.mrf.mxu2 }
 0x1ed   : > { %803 = vmatpush.bf16.msrb.mxu3 %v794_v20  ;;  %v869_v32 = vmax.f32 %v859_v21, 0.0 }
 0x1f0   : > { %2575 = vmatmul.msk.bf16.vlgmr.msrb.gmra.mxu3 %vm396_vm1, %v3266_v25 }
 0x1f1   : > { %1042 = vmatpush.bf16.msra.mxu3 %v2842_v18 }
 0x1f4   : > { %v861_v23 = vpop.f32.mrf.mxu2 }
 0x1f5   : > { %v870_v33 = vmax.f32 %v861_v23, 0.0 }
 0x1f6   : > { %2565 = vmatmul.msk.bf16.gmra.mxu0 %vm396_vm1, %v3285_v40 }
 0x1f7   : > { %v873_v38 = vpack.c.bf16 %v870_v33, %v869_v32 }
 0x1fc   : > { %v864_v26 = vpop.f32.mrf.mxu2 }
 0x1fd   : > { %v871_v27 = vmax.f32 %v864_v26, 0.0 }
 0x200   : > { %2576 = vmatmul.msk.bf16.gmra.mxu3 %vm396_vm1, %v3275_v30 }
 0x204   : > { %v866_v28 = vpop.f32.mrf.mxu2 }
 0x205   : > { %v872_v35 = vmax.f32 %v866_v28, 0.0 }
 0x206   : > { %2566 = vmatmul.msk.bf16.gmra.mxu0 %vm396_vm1, %v3297_v44 }
 0x207   : > { %v874_v36 = vpack.c.bf16 %v872_v35, %v871_v27 }
 0x209   : > { %881 = vmatpush.bf16.msra.mxu1 %v874_v36 }
 0x20d   : > { %882 = vmatpush.bf16.msra.mxu1 %v873_v38 }
 0x210   : > { %2577 = vmatmul.msk.bf16.gmra.mxu3 %vm396_vm1, %v3285_v40  ;;  %2587 = vmatmul.msk.bf16.vlgmr.msra.gmra.mxu1 %vm396_vm1, %v3266_v25 }
 0x211   : > { %1145 = vmatpush.bf16.msrb.mxu1 %v2843_v39 }
 0x216   : > { %2597 = vmatmul.msk.bf16.vlgmr.msra.gmra.mxu0 %vm344_vm0, %v3238_v2  ;;  %v3407_v2 = vld [vmem:[%s3978_s4 + $0x8] sm:$0xff] }
 0x220   : > { %2578 = vmatmul.msk.bf16.gmra.mxu3 %vm396_vm1, %v3297_v44  ;;  %2588 = vmatmul.msk.bf16.gmra.mxu1 %vm396_vm1, %v3275_v30 }
 0x226   : > { %2598 = vmatmul.msk.bf16.gmra.mxu0 %vm344_vm0, %v3248_v4 }
 0x230   : > { %2589 = vmatmul.msk.bf16.gmra.mxu1 %vm396_vm1, %v3285_v40  ;;  %2615 = vmatmul.msk.bf16.vlgmr.msra.gmra.mxu3 %vm344_vm0, %v3398_v42 }
 0x240   : > { %2590 = vmatmul.msk.bf16.gmra.mxu1 %vm396_vm1, %v3297_v44  ;;  %2616 = vmatmul.msk.bf16.gmra.mxu3 %vm344_vm0, %v3407_v2 }
 0x250   : > { %2643 = vmatmul.msk.bf16.vlgmr.msrb.gmra.mxu1 %vm344_vm0, %v3398_v42 }
 0x253   : > { %v726_v4 = vpop.f32.mrf.mxu0 }
 0x254   : > { %v746_v43 = vmax.f32 %v726_v4, 0.0 }
 0x256   : > { %v754_v45 = vmax.f32 %v3348_v29, %v746_v43 }
 0x25b   : > { %v3416_v47 = vpop.f32.mrf.mxu0 }
 0x260   : > { %2644 = vmatmul.msk.bf16.gmra.mxu1 %vm344_vm0, %v3407_v2 }
 0x263   : > { %v731_v48 = vpop.f32.mrf.mxu0 }
 0x264   : > { %v748_v50 = vmax.f32 %v731_v48, 0.0 }
 0x266   : > { %v756_v51 = vmax.f32 %v3356_v41, %v748_v50 }
 0x26b   : > { %v3421_v52 = vpop.f32.mrf.mxu0 }
 0x273   : > { %v736_v55 = vpop.f32.mrf.mxu0  ;;  %v805_v56 = vpop.f32.mrf.mxu3 }
 0x274   : > { %v750_v57 = vmax.f32 %v736_v55, 0.0  ;;  %v825_v58 = vmax.f32 %v805_v56, 0.0 }
 0x276   : > { %v758_v59 = vmax.f32 %v3362_v53, %v750_v57  ;;  %v833_v62 = vmax.f32 %v754_v45, %v825_v58 }
 0x27b   : > { %v3424_v0 = vpop.f32.mrf.mxu0  ;;  %v3426_v29 = vpop.f32.mrf.mxu3 }
 0x283   : > { %v741_v1 = vpop.f32.mrf.mxu0  ;;  %v810_v3 = vpop.f32.mrf.mxu3 }
 0x284   : > { %v752_v6 = vmax.f32 %v741_v1, 0.0  ;;  %v827_v9 = vmax.f32 %v810_v3, 0.0 }
 0x286   : > { %v760_v41 = vmax.f32 %v3368_v7, %v752_v6  ;;  %v835_v11 = vmax.f32 %v756_v51, %v827_v9 }
 0x28b   : > { %v3431_v12 = vpop.f32.mrf.mxu0  ;;  %v3433_v14 = vpop.f32.mrf.mxu3 }
 0x28d   : > { %v884_v15 = vpop.f32.mrf.mxu1 }
 0x28e   : > { %v904_v53 = vmax.f32 %v884_v15, 0.0 }
 0x290   : > { %v3435_v17 = vmax.f32 %v833_v62, %v904_v53 }
 0x293   : > { %v815_v18 = vpop.f32.mrf.mxu3  ;;  %v938_v20 = vpop.f32.mrf.mxu0 }
 0x294   : > { %v829_v21 = vmax.f32 %v815_v18, 0.0  ;;  %v948_v48 = vmax.f32 %v938_v20, 0.0 }
 0x295   : > { %v3437_v22 = vpop.f32.mrf.mxu1 }
 0x296   : > { %v837_v23 = vmax.f32 %v758_v59, %v829_v21 }
 0x29b   : > { %v3439_v26 = vpop.f32.mrf.mxu3  ;;  %v940_v27 = vpop.f32.mrf.mxu0 }
 0x29c   : > { %v949_v50 = vmax.f32 %v940_v27, 0.0 }
 0x29d   : > { %v889_v28 = vpop.f32.mrf.mxu1 }
 0x29e   : > { %v906_v7 = vmax.f32 %v889_v28, 0.0  ;;  %v952_v58 = vpack.c.bf16 %v949_v50, %v948_v48  ;;  %v2844_v28 = vld [vmem:[%s3227_s30 + $0x10] sm:$0xff] }
 0x2a0   : > { %v3441_v32 = vmax.f32 %v835_v11, %v906_v7  ;;  %v2845_v7 = vld [vmem:[%s3227_s30 + $0x18] sm:$0xff] }
 0x2a3   : > { %v820_v33 = vpop.f32.mrf.mxu3  ;;  %v943_v35 = vpop.f32.mrf.mxu0 }
 0x2a4   : > { %v831_v36 = vmax.f32 %v820_v33, 0.0  ;;  %v950_v4 = vmax.f32 %v943_v35, 0.0  ;;  %v3464_v35 = vld [vmem:[%s3979_s5] sm:$0xff] }
 0x2a5   : > { %v3443_v38 = vpop.f32.mrf.mxu1 }
 0x2a6   : > { %v839_v39 = vmax.f32 %v760_v41, %v831_v36 }
 0x2ab   : > { %v3445_v43 = vpop.f32.mrf.mxu3  ;;  %v945_v45 = vpop.f32.mrf.mxu0 }
 0x2ac   : > { %v951_v51 = vmax.f32 %v945_v45, 0.0 }
 0x2ad   : > { %v894_v55 = vpop.f32.mrf.mxu1 }
 0x2ae   : > { %v953_v56 = vpack.c.bf16 %v951_v51, %v950_v4  ;;  %v908_v57 = vmax.f32 %v894_v55, 0.0 }
 0x2b0   : > { %v3447_v59 = vmax.f32 %v837_v23, %v908_v57  ;;  %960 = vmatpush.bf16.msrb.mxu2 %v953_v56  ;;  %v3484_v56 = vld [vmem:[%s3979_s5 + $0x10] sm:$0xff]  ;;  %v2846_v57 = vld [vmem:[%s3227_s30 + $0x20] sm:$0xff] }
 0x2b3   : > { %v1044_v62 = vpop.f32.mrf.mxu3 }
 0x2b4   : > { %961 = vmatpush.bf16.msrb.mxu2 %v952_v58  ;;  %v439_v58 = vmax.f32 %v3328_v54, 0.0  ;;  %v905_v54 = vmax.f32 %v3437_v22, 0.0 }
 0x2b5   : > { %v3449_v1 = vpop.f32.mrf.mxu1 }
 0x2b7   : > { %2599 = vmatmul.msk.bf16.vlgmr.msrb.gmra.mxu2 %vm396_vm1, %v3266_v25  ;;  %v1054_v25 = vmax.f32 %v1044_v62, 0.0  ;;  %v510_v62 = vmax.f32 %v3332_v60, 0.0 }
 0x2b8   : > { %1224 = vmatpush.bf16.msra.mxu2 %v2844_v28 }
 0x2bb   : > { %v1046_v3 = vpop.f32.mrf.mxu3 }
 0x2bc   : > { %v1055_v23 = vmax.f32 %v1046_v3, 0.0  ;;  %v589_v3 = vmax.f32 %v3340_v13, 0.0 }
 0x2bd   : > { %v899_v6 = vpop.f32.mrf.mxu1 }
 0x2be   : > { %v910_v9 = vmax.f32 %v899_v6, 0.0  ;;  %v1058_v33 = vpack.c.bf16 %v1055_v23, %v1054_v25  ;;  %v518_v6 = vmax.f32 %v439_v58, %v510_v62  ;;  %v826_v23 = vmax.f32 %v3426_v29, 0.0 }
 0x2bf   : > { %v591_v29 = vmax.f32 %v3346_v24, 0.0  ;;  %v514_v62 = vmax.f32 %v3342_v16, 0.0 }
 0x2c0   : > { %v3453_v41 = vmax.f32 %v839_v39, %v910_v9  ;;  %v3473_v39 = vld [vmem:[%s3979_s5 + $0x8] sm:$0xff]  ;;  %v668_v9 = vmax.f32 %v3352_v34, 0.0 }
 0x2c3   : > { %v1049_v11 = vpop.f32.mrf.mxu3 }
 0x2c4   : > { %v1056_v18 = vmax.f32 %v1049_v11, 0.0 }
 0x2c5   : > { %v3455_v15 = vpop.f32.mrf.mxu1 }
 0x2c7   : > { %2600 = vmatmul.msk.bf16.gmra.mxu2 %vm396_vm1, %v3275_v30 }
 0x2cb   : > { %v1051_v53 = vpop.f32.mrf.mxu3 }
 0x2cc   : > { %v1057_v20 = vmax.f32 %v1051_v53, 0.0  ;;  %v597_v53 = vmax.f32 %v518_v6, %v589_v3  ;;  %v593_v3 = vmax.f32 %v3354_v37, 0.0 }
 0x2cd   : > { %v1147_v21 = vpop.f32.mrf.mxu1 }
 0x2ce   : > { %v1059_v27 = vpack.c.bf16 %v1057_v20, %v1056_v18  ;;  %v1157_v48 = vmax.f32 %v1147_v21, 0.0  ;;  %v747_v18 = vmax.f32 %v3416_v47, 0.0  ;;  %v676_v21 = vmax.f32 %v597_v53, %v668_v9 }
 0x2cf   : > { %v512_v47 = vmax.f32 %v3336_v5, 0.0  ;;  %v907_v5 = vmax.f32 %v3443_v38, 0.0  ;;  %v751_v38 = vmax.f32 %v3424_v0, 0.0  ;;  %v516_v0 = vmax.f32 %v3350_v31, 0.0 }
 0x2d0   : > { %1098 = vmatpush.bf16.msrb.mxu0 %v1059_v27  ;;  %v755_v28 = vmax.f32 %v676_v21, %v747_v18  ;;  %v909_v21 = vmax.f32 %v3449_v1, 0.0  ;;  %v753_v1 = vmax.f32 %v3431_v12, 0.0 }
 0x2d2   : > { %v834_v60 = vmax.f32 %v755_v28, %v826_v23 }
 0x2d4   : > { %1099 = vmatpush.bf16.msrb.mxu0 %v1058_v33  ;;  %v913_v25 = vmax.f32 %v834_v60, %v905_v54  ;;  %v445_v54 = vmax.f32 %v3344_v19, 0.0 }
 0x2d5   : > { %v1149_v36 = vpop.f32.mrf.mxu1 }
 0x2d6   : > { %v1158_v50 = vmax.f32 %v1149_v36, 0.0  ;;  %v670_v36 = vmax.f32 %v3358_v46, 0.0  ;;  %v443_v46 = vmax.f32 %v3338_v8, 0.0 }
 0x2d7   : > { %2601 = vmatmul.msk.bf16.gmra.mxu2 %vm396_vm1, %v3285_v40  ;;  %2633 = vmatmul.msk.bf16.vlgmr.msrb.gmra.mxu0 %vm396_vm1, %v3464_v35 }
 0x2d8   : > { %1303 = vmatpush.bf16.msra.mxu0 %v2845_v7  ;;  %v1161_v55 = vpack.c.bf16 %v1158_v50, %v1157_v48  ;;  %v441_v7 = vmax.f32 %v3334_v61, 0.0  ;;  %v828_v50 = vmax.f32 %v3433_v14, 0.0  ;;  %v522_v14 = vmax.f32 %v443_v46, %v514_v62 }
 0x2da   : > { %v601_v9 = vmax.f32 %v522_v14, %v593_v3 }
 0x2dd   : > { %v1152_v30 = vpop.f32.mrf.mxu1 }
 0x2de   : > { %v1159_v4 = vmax.f32 %v1152_v30, 0.0 }
 0x2e5   : > { %v1154_v45 = vpop.f32.mrf.mxu1 }
 0x2e6   : > { %v1160_v51 = vmax.f32 %v1154_v45, 0.0 }
 0x2e7   : > { %2602 = vmatmul.msk.bf16.gmra.mxu2 %vm396_vm1, %v3297_v44  ;;  %2634 = vmatmul.msk.bf16.gmra.mxu0 %vm396_vm1, %v3473_v39  ;;  %v3495_v44 = vld [vmem:[%s3979_s5 + $0x18] sm:$0xff] }
 0x2e8   : > { %v1162_v40 = vpack.c.bf16 %v1160_v51, %v1159_v4  ;;  %v749_v4 = vmax.f32 %v3421_v52, 0.0 }
 0x2ea   : > { %1169 = vmatpush.bf16.msrb.mxu3 %v1162_v40 }
 0x2ee   : > { %1170 = vmatpush.bf16.msrb.mxu3 %v1161_v55 }
 0x2f1   : > { %2645 = vmatmul.msk.bf16.vlgmr.msrb.gmra.mxu3 %vm396_vm1, %v3464_v35 }
 0x2f2   : > { %1382 = vmatpush.bf16.msra.mxu3 %v2846_v57 }
 0x2f7   : > { %2635 = vmatmul.msk.bf16.gmra.mxu0 %vm396_vm1, %v3484_v56  ;;  %2655 = vmatmul.msk.bf16.vlgmr.msra.gmra.mxu2 %vm344_vm0, %v3398_v42 }
 0x301   : > { %2646 = vmatmul.msk.bf16.gmra.mxu3 %vm396_vm1, %v3473_v39 }
 0x307   : > { %2636 = vmatmul.msk.bf16.gmra.mxu0 %vm396_vm1, %v3495_v44  ;;  %2656 = vmatmul.msk.bf16.gmra.mxu2 %vm344_vm0, %v3407_v2 }
 0x311   : > { %2647 = vmatmul.msk.bf16.gmra.mxu3 %vm396_vm1, %v3484_v56 }
 0x317   : > { %2667 = vmatmul.msk.bf16.vlgmr.msra.gmra.mxu0 %vm344_vm0, %v3398_v42 }
 0x321   : > { %2648 = vmatmul.msk.bf16.gmra.mxu3 %vm396_vm1, %v3495_v44 }
 0x327   : > { %2668 = vmatmul.msk.bf16.gmra.mxu0 %vm344_vm0, %v3407_v2 }
 0x331   : > { %2679 = vmatmul.msk.bf16.vlgmr.msra.gmra.mxu3 %vm344_vm0, %v3398_v42 }
 0x33a   : > { %v963_v11 = vpop.f32.mrf.mxu2 }
 0x33b   : > { %v983_v20 = vmax.f32 %v963_v11, 0.0 }
 0x33d   : > { %v991_v27 = vmax.f32 %v3435_v17, %v983_v20  ;;  %v520_v17 = vmax.f32 %v441_v7, %v512_v47  ;;  %v830_v20 = vmax.f32 %v3439_v26, 0.0  ;;  %v524_v26 = vmax.f32 %v445_v54, %v516_v0 }
 0x33f   : > { %2314 = vxpose.xlu0.b32.start [1/16] %v991_v27, 128  ;;  %v599_v30 = vmax.f32 %v520_v17, %v591_v29  ;;  %v832_v29 = vmax.f32 %v3445_v43, 0.0  ;;  %v911_v17 = vmax.f32 %v3455_v15, 0.0 }
 0x341   : > { %2680 = vmatmul.msk.bf16.gmra.mxu3 %vm344_vm0, %v3407_v2  ;;  %v678_v48 = vmax.f32 %v599_v30, %v670_v36 }
 0x342   : > { %v965_v13 = vpop.f32.mrf.mxu2 }
 0x343   : > { %v984_v34 = vmax.f32 %v965_v13, 0.0  ;;  %v757_v61 = vmax.f32 %v678_v48, %v749_v4  ;;  %v595_v13 = vmax.f32 %v3360_v49, 0.0 }
 0x345   : > { %v992_v33 = vmax.f32 %v913_v25, %v984_v34  ;;  %v836_v40 = vmax.f32 %v757_v61, %v828_v50  ;;  %v603_v25 = vmax.f32 %v524_v26, %v595_v13 }
 0x347   : > { %2315 = vxpose.xlu0.b32.cont [2/16] %v992_v33, 128  ;;  %v915_v57 = vmax.f32 %v836_v40, %v907_v5 }
 0x34a   : > { %v968_v22 = vpop.f32.mrf.mxu2 }
 0x34b   : > { %v985_v45 = vmax.f32 %v968_v22, 0.0 }
 0x34d   : > { %v993_v51 = vmax.f32 %v3441_v32, %v985_v45  ;;  %v672_v32 = vmax.f32 %v3364_v63, 0.0 }
 0x34f   : > { %2316 = vxpose.xlu0.b32.cont [3/16] %v993_v51, 128  ;;  %v680_v18 = vmax.f32 %v601_v9, %v672_v32 }
 0x351   : > { %v759_v16 = vmax.f32 %v680_v18, %v751_v38 }
 0x352   : > { %v970_v24 = vpop.f32.mrf.mxu2 }
 0x353   : > { %v986_v55 = vmax.f32 %v970_v24, 0.0  ;;  %v838_v37 = vmax.f32 %v759_v16, %v830_v20 }
 0x354   : > { %v1101_v58 = vpop.f32.mrf.mxu0 }
 0x355   : > { %v994_v52 = vmax.f32 %v915_v57, %v986_v55  ;;  %v917_v63 = vmax.f32 %v838_v37, %v909_v21  ;;  %v1121_v45 = vmax.f32 %v1101_v58, 0.0 }
 0x357   : > { %2317 = vxpose.xlu0.b32.cont [4/16] %v994_v52, 128 }
 0x35a   : > { %v973_v6 = vpop.f32.mrf.mxu2 }
 0x35b   : > { %v987_v11 = vmax.f32 %v973_v6, 0.0 }
 0x35c   : > { %v3535_v53 = vpop.f32.mrf.mxu0 }
 0x35d   : > { %v995_v8 = vmax.f32 %v3447_v59, %v987_v11  ;;  %v674_v59 = vmax.f32 %v3428_v10, 0.0 }
 0x35f   : > { %2318 = vxpose.xlu0.b32.cont [5/16] %v995_v8, 128  ;;  %v682_v33 = vmax.f32 %v603_v25, %v674_v59  ;;  %v2848_v25 = vld [vmem:[%s3227_s30 + $0x30] sm:$0xff] }
 0x361   : > { %v761_v31 = vmax.f32 %v682_v33, %v753_v1  ;;  %v2847_v33 = vld [vmem:[%s3227_s30 + $0x28] sm:$0xff] }
 0x362   : > { %v975_v23 = vpop.f32.mrf.mxu2 }
 0x363   : > { %v988_v27 = vmax.f32 %v975_v23, 0.0  ;;  %v840_v49 = vmax.f32 %v761_v31, %v832_v29 }
 0x364   : > { %v1106_v28 = vpop.f32.mrf.mxu0 }
 0x365   : > { %v996_v60 = vmax.f32 %v917_v63, %v988_v27  ;;  %v919_v10 = vmax.f32 %v840_v49, %v911_v17  ;;  %v1123_v40 = vmax.f32 %v1106_v28, 0.0 }
 0x367   : > { %2319 = vxpose.xlu0.b32.cont [6/16] %v996_v60, 128 }
 0x36a   : > { %v978_v34 = vpop.f32.mrf.mxu2 }
 0x36b   : > { %v989_v7 = vmax.f32 %v978_v34, 0.0 }
 0x36c   : > { %v3545_v47 = vpop.f32.mrf.mxu0 }
 0x36d   : > { %v997_v19 = vmax.f32 %v3453_v41, %v989_v7 }
 0x36f   : > { %2320 = vxpose.xlu0.b32.cont [7/16] %v997_v19, 128 }
 0x372   : > { %v980_v36 = vpop.f32.mrf.mxu2 }
 0x373   : > { %v990_v22 = vmax.f32 %v980_v36, 0.0 }
 0x374   : > { %v1111_v30 = vpop.f32.mrf.mxu0  ;;  %v1172_v4 = vpop.f32.mrf.mxu3 }
 0x375   : > { %v1192_v12 = vmax.f32 %v1172_v4, 0.0  ;;  %v998_v48 = vmax.f32 %v919_v10, %v990_v22  ;;  %v1125_v38 = vmax.f32 %v1111_v30, 0.0  ;;  %v2849_v4 = vld [vmem:[%s3227_s30 + $0x38] sm:$0xff] }
 0x377   : > { %v3550_v50 = vmax.f32 %v1121_v45, %v1192_v12  ;;  %2321 = vxpose.xlu0.b32.cont [8/16] %v998_v48, 128 }
 0x37a   : > { %v1226_v51 = vpop.f32.mrf.mxu2 }
 0x37b   : > { %v1236_v3 = vmax.f32 %v1226_v51, 0.0 }
 0x37c   : > { %v3552_v43 = vpop.f32.mrf.mxu0  ;;  %v3554_v41 = vpop.f32.mrf.mxu3 }
 0x382   : > { %v1228_v61 = vpop.f32.mrf.mxu2 }
 0x383   : > { %v1237_v14 = vmax.f32 %v1228_v61, 0.0 }
 0x384   : > { %v1116_v15 = vpop.f32.mrf.mxu0  ;;  %v1177_v5 = vpop.f32.mrf.mxu3 }
 0x385   : > { %v1194_v24 = vmax.f32 %v1177_v5, 0.0  ;;  %v1240_v20 = vpack.c.bf16 %v1237_v14, %v1236_v3  ;;  %v1127_v27 = vmax.f32 %v1116_v15, 0.0 }
 0x387   : > { %v3556_v55 = vmax.f32 %v1123_v40, %v1194_v24 }
 0x38a   : > { %v1231_v57 = vpop.f32.mrf.mxu2 }
 0x38b   : > { %v1238_v62 = vmax.f32 %v1231_v57, 0.0 }
 0x38c   : > { %v3558_v46 = vpop.f32.mrf.mxu0  ;;  %v3560_v58 = vpop.f32.mrf.mxu3 }
 0x392   : > { %v1233_v52 = vpop.f32.mrf.mxu2 }
 0x393   : > { %v1239_v32 = vmax.f32 %v1233_v52, 0.0 }
 0x394   : > { %v1182_v6 = vpop.f32.mrf.mxu3  ;;  %v1305_v9 = vpop.f32.mrf.mxu0 }
 0x395   : > { %v1241_v11 = vpack.c.bf16 %v1239_v32, %v1238_v62  ;;  %v1196_v18 = vmax.f32 %v1182_v6, 0.0  ;;  %v1315_v34 = vmax.f32 %v1305_v9, 0.0 }
 0x397   : > { %v3562_v8 = vmax.f32 %v1125_v38, %v1196_v18  ;;  %1248 = vmatpush.bf16.msra.mxu1 %v1241_v11 }
 0x39b   : > { %1249 = vmatpush.bf16.msra.mxu1 %v1240_v20 }
 0x39c   : > { %v3564_v16 = vpop.f32.mrf.mxu3  ;;  %v1307_v21 = vpop.f32.mrf.mxu0 }
 0x39d   : > { %v1316_v26 = vmax.f32 %v1307_v21, 0.0 }
 0x39e   : > { %2657 = vmatmul.msk.bf16.vlgmr.msra.gmra.mxu1 %vm396_vm1, %v3464_v35 }
 0x39f   : > { %v1319_v1 = vpack.c.bf16 %v1316_v26, %v1315_v34  ;;  %1461 = vmatpush.bf16.msrb.mxu1 %v2847_v33 }
 0x3a4   : > { %v1187_v37 = vpop.f32.mrf.mxu3  ;;  %v1310_v23 = vpop.f32.mrf.mxu0 }
 0x3a5   : > { %v1198_v63 = vmax.f32 %v1187_v37, 0.0  ;;  %v1317_v60 = vmax.f32 %v1310_v23, 0.0 }
 0x3a7   : > { %v3568_v28 = vmax.f32 %v1127_v27, %v1198_v63 }
 0x3ac   : > { %v3570_v54 = vpop.f32.mrf.mxu3  ;;  %v1312_v0 = vpop.f32.mrf.mxu0 }
 0x3ad   : > { %v1318_v13 = vmax.f32 %v1312_v0, 0.0 }
 0x3ae   : > { %2658 = vmatmul.msk.bf16.gmra.mxu1 %vm396_vm1, %v3473_v39 }
 0x3af   : > { %v1320_v59 = vpack.c.bf16 %v1318_v13, %v1317_v60 }
 0x3b1   : > { %1327 = vmatpush.bf16.msrb.mxu2 %v1320_v59 }
 0x3b4   : > { %v1384_v7 = vpop.f32.mrf.mxu3 }
 0x3b5   : > { %1328 = vmatpush.bf16.msrb.mxu2 %v1319_v1  ;;  %v1394_v49 = vmax.f32 %v1384_v7, 0.0 }
 0x3b8   : > { %2669 = vmatmul.msk.bf16.vlgmr.msrb.gmra.mxu2 %vm396_vm1, %v3464_v35 }
 0x3b9   : > { %1540 = vmatpush.bf16.msra.mxu2 %v2848_v25 }
 0x3bc   : > { %v1386_v29 = vpop.f32.mrf.mxu3 }
 0x3bd   : > { %v1395_v36 = vmax.f32 %v1386_v29, 0.0 }
 0x3be   : > { %2659 = vmatmul.msk.bf16.gmra.mxu1 %vm396_vm1, %v3484_v56 }
 0x3bf   : > { %v1398_v30 = vpack.c.bf16 %v1395_v36, %v1394_v49 }
 0x3c4   : > { %v1389_v19 = vpop.f32.mrf.mxu3 }
 0x3c5   : > { %v1396_v31 = vmax.f32 %v1389_v19, 0.0 }
 0x3c8   : > { %2670 = vmatmul.msk.bf16.gmra.mxu2 %vm396_vm1, %v3473_v39 }
 0x3cc   : > { %v1391_v17 = vpop.f32.mrf.mxu3 }
 0x3cd   : > { %v1397_v22 = vmax.f32 %v1391_v17, 0.0 }
 0x3ce   : > { %2660 = vmatmul.msk.bf16.gmra.mxu1 %vm396_vm1, %v3495_v44 }
 0x3cf   : > { %v1399_v10 = vpack.c.bf16 %v1397_v22, %v1396_v31 }
 0x3d1   : > { %1406 = vmatpush.bf16.msrb.mxu0 %v1399_v10 }
 0x3d5   : > { %1407 = vmatpush.bf16.msrb.mxu0 %v1398_v30 }
 0x3d8   : > { %2671 = vmatmul.msk.bf16.gmra.mxu2 %vm396_vm1, %v3484_v56  ;;  %2681 = vmatmul.msk.bf16.vlgmr.msrb.gmra.mxu0 %vm396_vm1, %v3464_v35 }
 0x3d9   : > { %1619 = vmatpush.bf16.msra.mxu0 %v2849_v4 }
 0x3de   : > { %2691 = vmatmul.msk.bf16.vlgmr.msrb.gmra.mxu1 %vm344_vm0, %v3398_v42 }
 0x3e8   : > { %2672 = vmatmul.msk.bf16.gmra.mxu2 %vm396_vm1, %v3495_v44  ;;  %2682 = vmatmul.msk.bf16.gmra.mxu0 %vm396_vm1, %v3473_v39 }
 0x3ee   : > { %2692 = vmatmul.msk.bf16.gmra.mxu1 %vm344_vm0, %v3407_v2 }
 0x3f8   : > { %2683 = vmatmul.msk.bf16.gmra.mxu0 %vm396_vm1, %v3484_v56  ;;  %2703 = vmatmul.msk.bf16.vlgmr.msra.gmra.mxu2 %vm344_vm0, %v3398_v42 }
 0x408   : > { %2684 = vmatmul.msk.bf16.gmra.mxu0 %vm396_vm1, %v3495_v44  ;;  %2704 = vmatmul.msk.bf16.gmra.mxu2 %vm344_vm0, %v3407_v2 }
 0x418   : > { %2715 = vmatmul.msk.bf16.vlgmr.msra.gmra.mxu0 %vm344_vm0, %v3398_v42 }
 0x41b   : > { %v1251_v45 = vpop.f32.mrf.mxu1 }
 0x41c   : > { %v1271_v12 = vmax.f32 %v1251_v45, 0.0 }
 0x41e   : > { %v1279_v48 = vmax.f32 %v3550_v50, %v1271_v12 }
 0x423   : > { %v3608_v51 = vpop.f32.mrf.mxu1 }
 0x428   : > { %2716 = vmatmul.msk.bf16.gmra.mxu0 %vm344_vm0, %v3407_v2 }
 0x42b   : > { %v1256_v61 = vpop.f32.mrf.mxu1 }
 0x42c   : > { %v1273_v15 = vmax.f32 %v1256_v61, 0.0 }
 0x42e   : > { %v1281_v5 = vmax.f32 %v3556_v55, %v1273_v15 }
 0x433   : > { %v3613_v40 = vpop.f32.mrf.mxu1 }
 0x43b   : > { %v1261_v24 = vpop.f32.mrf.mxu1  ;;  %v1330_v57 = vpop.f32.mrf.mxu2 }
 0x43c   : > { %v1275_v62 = vmax.f32 %v1261_v24, 0.0  ;;  %v1350_v52 = vmax.f32 %v1330_v57, 0.0 }
 0x43e   : > { %v1283_v3 = vmax.f32 %v3562_v8, %v1275_v62  ;;  %v1358_v14 = vmax.f32 %v1279_v48, %v1350_v52 }
 0x443   : > { %v3616_v32 = vpop.f32.mrf.mxu1  ;;  %v3618_v50 = vpop.f32.mrf.mxu2 }
 0x44b   : > { %v1266_v6 = vpop.f32.mrf.mxu1  ;;  %v1335_v9 = vpop.f32.mrf.mxu2 }
 0x44c   : > { %v1277_v38 = vmax.f32 %v1266_v6, 0.0  ;;  %v1352_v11 = vmax.f32 %v1335_v9, 0.0 }
 0x44e   : > { %v1285_v18 = vmax.f32 %v3568_v28, %v1277_v38  ;;  %v1360_v55 = vmax.f32 %v1281_v5, %v1352_v11 }
 0x453   : > { %v3621_v20 = vpop.f32.mrf.mxu1  ;;  %v3623_v21 = vpop.f32.mrf.mxu2 }
 0x455   : > { %v1409_v37 = vpop.f32.mrf.mxu0 }
 0x456   : > { %v1429_v23 = vmax.f32 %v1409_v37, 0.0 }
 0x458   : > { %v3625_v27 = vmax.f32 %v1358_v14, %v1429_v23  ;;  %v2851_v23 = vld [vmem:[%s3227_s30 + $0x48] sm:$0xff] }
 0x45b   : > { %v1340_v8 = vpop.f32.mrf.mxu2  ;;  %v1463_v63 = vpop.f32.mrf.mxu1 }
 0x45c   : > { %v1354_v0 = vmax.f32 %v1340_v8, 0.0  ;;  %v1473_v36 = vmax.f32 %v1463_v63, 0.0 }
 0x45d   : > { %v3627_v60 = vpop.f32.mrf.mxu0 }
 0x45e   : > { %v1362_v13 = vmax.f32 %v1283_v3, %v1354_v0 }
 0x463   : > { %v3629_v26 = vpop.f32.mrf.mxu2  ;;  %v1465_v59 = vpop.f32.mrf.mxu1 }
 0x464   : > { %v1474_v22 = vmax.f32 %v1465_v59, 0.0 }
 0x465   : > { %v1414_v34 = vpop.f32.mrf.mxu0 }
 0x466   : > { %v1431_v28 = vmax.f32 %v1414_v34, 0.0  ;;  %v1477_v12 = vpack.c.bf16 %v1474_v22, %v1473_v36 }
 0x468   : > { %v3631_v25 = vmax.f32 %v1360_v55, %v1431_v28  ;;  %v2850_v55 = vld [vmem:[%s3227_s30 + $0x40] sm:$0xff] }
 0x46b   : > { %v1345_v1 = vpop.f32.mrf.mxu2  ;;  %v1468_v7 = vpop.f32.mrf.mxu1 }
 0x46c   : > { %v1356_v33 = vmax.f32 %v1345_v1, 0.0  ;;  %v1475_v31 = vmax.f32 %v1468_v7, 0.0 }
 0x46d   : > { %v3633_v29 = vpop.f32.mrf.mxu0 }
 0x46e   : > { %v1364_v19 = vmax.f32 %v1285_v18, %v1356_v33 }
 0x473   : > { %v3635_v17 = vpop.f32.mrf.mxu2  ;;  %v1470_v49 = vpop.f32.mrf.mxu1 }
 0x474   : > { %v1476_v10 = vmax.f32 %v1470_v49, 0.0 }
 0x475   : > { %v1419_v30 = vpop.f32.mrf.mxu0 }
 0x476   : > { %v1478_v4 = vpack.c.bf16 %v1476_v10, %v1475_v31  ;;  %v1433_v45 = vmax.f32 %v1419_v30, 0.0 }
 0x478   : > { %v3637_v48 = vmax.f32 %v1362_v13, %v1433_v45  ;;  %1485 = vmatpush.bf16.msrb.mxu3 %v1478_v4 }
 0x47b   : > { %v1542_v61 = vpop.f32.mrf.mxu2 }
 0x47c   : > { %1486 = vmatpush.bf16.msrb.mxu3 %v1477_v12  ;;  %v1552_v37 = vmax.f32 %v1542_v61, 0.0 }
 0x47d   : > { %v3639_v15 = vpop.f32.mrf.mxu0 }
 0x47f   : > { %2693 = vmatmul.msk.bf16.vlgmr.msrb.gmra.mxu3 %vm396_vm1, %v3464_v35 }
 0x480   : > { %1698 = vmatpush.bf16.msra.mxu3 %v2850_v55 }
 0x483   : > { %v1544_v5 = vpop.f32.mrf.mxu2 }
 0x484   : > { %v1553_v11 = vmax.f32 %v1544_v5, 0.0 }
 0x485   : > { %v1424_v24 = vpop.f32.mrf.mxu0 }
 0x486   : > { %v1435_v57 = vmax.f32 %v1424_v24, 0.0  ;;  %v1556_v8 = vpack.c.bf16 %v1553_v11, %v1552_v37 }
 0x488   : > { %v3643_v62 = vmax.f32 %v1364_v19, %v1435_v57  ;;  %v2852_v19 = vld [vmem:[%s3227_s30 + $0x50] sm:$0xff] }
 0x48b   : > { %v1547_v52 = vpop.f32.mrf.mxu2 }
 0x48c   : > { %v1554_v6 = vmax.f32 %v1547_v52, 0.0 }
 0x48d   : > { %v3645_v3 = vpop.f32.mrf.mxu0 }
 0x48f   : > { %2694 = vmatmul.msk.bf16.gmra.mxu3 %vm396_vm1, %v3473_v39 }
 0x493   : > { %v1549_v14 = vpop.f32.mrf.mxu2 }
 0x494   : > { %v1555_v9 = vmax.f32 %v1549_v14, 0.0 }
 0x495   : > { %v1621_v38 = vpop.f32.mrf.mxu0 }
 0x496   : > { %v1557_v18 = vpack.c.bf16 %v1555_v9, %v1554_v6  ;;  %v1631_v34 = vmax.f32 %v1621_v38, 0.0 }
 0x498   : > { %1564 = vmatpush.bf16.msra.mxu1 %v1557_v18 }
 0x49c   : > { %1565 = vmatpush.bf16.msra.mxu1 %v1556_v8 }
 0x49d   : > { %v1623_v63 = vpop.f32.mrf.mxu0 }
 0x49e   : > { %v1632_v28 = vmax.f32 %v1623_v63, 0.0 }
 0x49f   : > { %2695 = vmatmul.msk.bf16.gmra.mxu3 %vm396_vm1, %v3484_v56  ;;  %2705 = vmatmul.msk.bf16.vlgmr.msra.gmra.mxu1 %vm396_vm1, %v3464_v35 }
 0x4a0   : > { %1777 = vmatpush.bf16.msrb.mxu1 %v2851_v23  ;;  %v1635_v33 = vpack.c.bf16 %v1632_v28, %v1631_v34 }
 0x4a5   : > { %v1626_v0 = vpop.f32.mrf.mxu0 }
 0x4a6   : > { %v1633_v13 = vmax.f32 %v1626_v0, 0.0 }
 0x4ad   : > { %v1628_v59 = vpop.f32.mrf.mxu0 }
 0x4ae   : > { %v1634_v1 = vmax.f32 %v1628_v59, 0.0 }
 0x4af   : > { %2696 = vmatmul.msk.bf16.gmra.mxu3 %vm396_vm1, %v3495_v44  ;;  %2706 = vmatmul.msk.bf16.gmra.mxu1 %vm396_vm1, %v3473_v39 }
 0x4b0   : > { %v1636_v7 = vpack.c.bf16 %v1634_v1, %v1633_v13 }
 0x4b2   : > { %1643 = vmatpush.bf16.msrb.mxu2 %v1636_v7 }
 0x4b6   : > { %1644 = vmatpush.bf16.msrb.mxu2 %v1635_v33 }
 0x4b9   : > { %2717 = vmatmul.msk.bf16.vlgmr.msrb.gmra.mxu2 %vm396_vm1, %v3464_v35 }
 0x4ba   : > { %1856 = vmatpush.bf16.msra.mxu2 %v2852_v19 }
 0x4bf   : > { %2707 = vmatmul.msk.bf16.gmra.mxu1 %vm396_vm1, %v3484_v56  ;;  %2727 = vmatmul.msk.bf16.vlgmr.msra.gmra.mxu3 %vm344_vm0, %v3398_v42 }
 0x4c9   : > { %2718 = vmatmul.msk.bf16.gmra.mxu2 %vm396_vm1, %v3473_v39 }
 0x4cf   : > { %2708 = vmatmul.msk.bf16.gmra.mxu1 %vm396_vm1, %v3495_v44  ;;  %2728 = vmatmul.msk.bf16.gmra.mxu3 %vm344_vm0, %v3407_v2 }
 0x4d9   : > { %2719 = vmatmul.msk.bf16.gmra.mxu2 %vm396_vm1, %v3484_v56 }
 0x4df   : > { %2739 = vmatmul.msk.bf16.vlgmr.msrb.gmra.mxu1 %vm344_vm0, %v3398_v42 }
 0x4e9   : > { %2720 = vmatmul.msk.bf16.gmra.mxu2 %vm396_vm1, %v3495_v44 }
 0x4ef   : > { %2740 = vmatmul.msk.bf16.gmra.mxu1 %vm344_vm0, %v3407_v2 }
 0x4f9   : > { %2751 = vmatmul.msk.bf16.vlgmr.msra.gmra.mxu2 %vm344_vm0, %v3398_v42 }
 0x502   : > { %v1488_v31 = vpop.f32.mrf.mxu3 }
 0x503   : > { %v1508_v49 = vmax.f32 %v1488_v31, 0.0 }
 0x505   : > { %v1516_v36 = vmax.f32 %v3625_v27, %v1508_v49 }
 0x509   : > { %2752 = vmatmul.msk.bf16.gmra.mxu2 %vm344_vm0, %v3407_v2 }
 0x50a   : > { %v3685_v22 = vpop.f32.mrf.mxu3 }
 0x512   : > { %v1493_v10 = vpop.f32.mrf.mxu3 }
 0x513   : > { %v1510_v30 = vmax.f32 %v1493_v10, 0.0 }
 0x515   : > { %v1518_v4 = vmax.f32 %v3631_v25, %v1510_v30 }
 0x51a   : > { %v3688_v45 = vpop.f32.mrf.mxu3 }
 0x51c   : > { %v1567_v12 = vpop.f32.mrf.mxu1 }
 0x51d   : > { %v1587_v61 = vmax.f32 %v1567_v12, 0.0 }
 0x51f   : > { %v1595_v5 = vmax.f32 %v1516_v36, %v1587_v61 }
 0x522   : > { %v1498_v24 = vpop.f32.mrf.mxu3 }
 0x523   : > { %v1512_v57 = vmax.f32 %v1498_v24, 0.0 }
 0x524   : > { %v3690_v52 = vpop.f32.mrf.mxu1 }
 0x525   : > { %v1520_v27 = vmax.f32 %v3637_v48, %v1512_v57 }
 0x52a   : > { %v3693_v14 = vpop.f32.mrf.mxu3 }
 0x52c   : > { %v1572_v6 = vpop.f32.mrf.mxu1 }
 0x52d   : > { %v1589_v9 = vmax.f32 %v1572_v6, 0.0 }
 0x52f   : > { %v1597_v38 = vmax.f32 %v1518_v4, %v1589_v9 }
 0x532   : > { %v1503_v11 = vpop.f32.mrf.mxu3 }
 0x533   : > { %v1514_v18 = vmax.f32 %v1503_v11, 0.0 }
 0x534   : > { %v3695_v55 = vpop.f32.mrf.mxu1 }
 0x535   : > { %v1522_v25 = vmax.f32 %v3643_v62, %v1514_v18 }
 0x53a   : > { %v3698_v37 = vpop.f32.mrf.mxu3 }
 0x53c   : > { %v1577_v23 = vpop.f32.mrf.mxu1  ;;  %v1646_v8 = vpop.f32.mrf.mxu2 }
 0x53d   : > { %v1591_v63 = vmax.f32 %v1577_v23, 0.0  ;;  %v1666_v0 = vmax.f32 %v1646_v8, 0.0 }
 0x53f   : > { %v1599_v13 = vmax.f32 %v1520_v27, %v1591_v63  ;;  %v3700_v59 = vmax.f32 %v1595_v5, %v1666_v0 }
 0x542   : > { %v1700_v48 = vpop.f32.mrf.mxu3 }
 0x543   : > { %v1710_v61 = vmax.f32 %v1700_v48, 0.0 }
 0x544   : > { %v3702_v34 = vpop.f32.mrf.mxu1  ;;  %v3704_v28 = vpop.f32.mrf.mxu2 }
 0x54a   : > { %v1702_v1 = vpop.f32.mrf.mxu3 }
 0x54b   : > { %v1711_v5 = vmax.f32 %v1702_v1, 0.0 }
 0x54c   : > { %v1582_v7 = vpop.f32.mrf.mxu1  ;;  %v1651_v33 = vpop.f32.mrf.mxu2 }
 0x54d   : > { %v1593_v19 = vmax.f32 %v1582_v7, 0.0  ;;  %v1668_v31 = vmax.f32 %v1651_v33, 0.0  ;;  %v1714_v11 = vpack.c.bf16 %v1711_v5, %v1710_v61  ;;  %v2853_v61 = vld [vmem:[%s3227_s30 + $0x58] sm:$0xff] }
 0x54f   : > { %v1601_v62 = vmax.f32 %v1522_v25, %v1593_v19  ;;  %v3706_v49 = vmax.f32 %v1597_v38, %v1668_v31 }
 0x552   : > { %v1705_v36 = vpop.f32.mrf.mxu3 }
 0x553   : > { %v1712_v4 = vmax.f32 %v1705_v36, 0.0  ;;  %v2854_v36 = vld [vmem:[%s3227_s30 + $0x60] sm:$0xff] }
 0x554   : > { %v3708_v10 = vpop.f32.mrf.mxu1  ;;  %v3710_v30 = vpop.f32.mrf.mxu2 }
 0x55a   : > { %v1707_v12 = vpop.f32.mrf.mxu3 }
 0x55b   : > { %v1713_v24 = vmax.f32 %v1707_v12, 0.0 }
 0x55c   : > { %v1656_v57 = vpop.f32.mrf.mxu2  ;;  %v1779_v27 = vpop.f32.mrf.mxu1 }
 0x55d   : > { %v1715_v6 = vpack.c.bf16 %v1713_v24, %v1712_v4  ;;  %v1670_v9 = vmax.f32 %v1656_v57, 0.0  ;;  %v1789_v31 = vmax.f32 %v1779_v27, 0.0 }
 0x55f   : > { %v3712_v18 = vmax.f32 %v1599_v13, %v1670_v9  ;;  %1722 = vmatpush.bf16.msrb.mxu0 %v1715_v6 }
 0x563   : > { %1723 = vmatpush.bf16.msrb.mxu0 %v1714_v11 }
 0x564   : > { %v3714_v38 = vpop.f32.mrf.mxu2  ;;  %v1781_v25 = vpop.f32.mrf.mxu1 }
 0x565   : > { %v1790_v33 = vmax.f32 %v1781_v25, 0.0 }
 0x566   : > { %2729 = vmatmul.msk.bf16.vlgmr.msrb.gmra.mxu0 %vm396_vm1, %v3464_v35 }
 0x567   : > { %v1793_v4 = vpack.c.bf16 %v1790_v33, %v1789_v31  ;;  %1935 = vmatpush.bf16.msra.mxu0 %v2853_v61  ;;  %v1122_v33 = vmax.f32 %v3535_v53, 0.0  ;;  %v1351_v31 = vmax.f32 %v3618_v50, 0.0  ;;  %v1667_v53 = vmax.f32 %v3704_v28, 0.0 }
 0x568   : > { %v1353_v28 = vmax.f32 %v3623_v21, 0.0 }
 0x56c   : > { %v1661_v23 = vpop.f32.mrf.mxu2  ;;  %v1784_v8 = vpop.f32.mrf.mxu1 }
 0x56d   : > { %v1672_v63 = vmax.f32 %v1661_v23, 0.0  ;;  %v1791_v13 = vmax.f32 %v1784_v8, 0.0  ;;  %v2855_v23 = vld [vmem:[%s3227_s30 + $0x68] sm:$0xff] }
 0x56f   : > { %v3718_v0 = vmax.f32 %v1601_v62, %v1672_v63 }
 0x574   : > { %v3720_v48 = vpop.f32.mrf.mxu2  ;;  %v1786_v1 = vpop.f32.mrf.mxu1 }
 0x575   : > { %v1792_v7 = vmax.f32 %v1786_v1, 0.0 }
 0x576   : > { %2730 = vmatmul.msk.bf16.gmra.mxu0 %vm396_vm1, %v3473_v39 }
 0x577   : > { %v1794_v19 = vpack.c.bf16 %v1792_v7, %v1791_v13 }
 0x579   : > { %1801 = vmatpush.bf16.msrb.mxu3 %v1794_v19  ;;  %v1272_v19 = vmax.f32 %v3608_v51, 0.0 }
 0x57c   : > { %v1858_v12 = vpop.f32.mrf.mxu2 }
 0x57d   : > { %1802 = vmatpush.bf16.msrb.mxu3 %v1793_v4  ;;  %v1868_v27 = vmax.f32 %v1858_v12, 0.0 }
 0x580   : > { %2741 = vmatmul.msk.bf16.vlgmr.msrb.gmra.mxu3 %vm396_vm1, %v3464_v35 }
 0x581   : > { %2014 = vmatpush.bf16.msra.mxu3 %v2854_v36 }
 0x584   : > { %v1860_v62 = vpop.f32.mrf.mxu2 }
 0x585   : > { %v1869_v6 = vmax.f32 %v1860_v62, 0.0 }
 0x586   : > { %2731 = vmatmul.msk.bf16.gmra.mxu0 %vm396_vm1, %v3484_v56 }
 0x587   : > { %v1872_v25 = vpack.c.bf16 %v1869_v6, %v1868_v27 }
 0x58c   : > { %v1863_v5 = vpop.f32.mrf.mxu2 }
 0x58d   : > { %v1870_v24 = vmax.f32 %v1863_v5, 0.0 }
 0x590   : > { %2742 = vmatmul.msk.bf16.gmra.mxu3 %vm396_vm1, %v3473_v39 }
 0x594   : > { %v1865_v57 = vpop.f32.mrf.mxu2 }
 0x595   : > { %v1871_v9 = vmax.f32 %v1865_v57, 0.0 }
 0x596   : > { %2732 = vmatmul.msk.bf16.gmra.mxu0 %vm396_vm1, %v3495_v44 }
 0x597   : > { %v1873_v11 = vpack.c.bf16 %v1871_v9, %v1870_v24 }
 0x599   : > { %1880 = vmatpush.bf16.msra.mxu1 %v1873_v11  ;;  %v1124_v11 = vmax.f32 %v3545_v47, 0.0 }
 0x59d   : > { %1881 = vmatpush.bf16.msra.mxu1 %v1872_v25 }
 0x5a0   : > { %2743 = vmatmul.msk.bf16.gmra.mxu3 %vm396_vm1, %v3484_v56  ;;  %2753 = vmatmul.msk.bf16.vlgmr.msra.gmra.mxu1 %vm396_vm1, %v3464_v35 }
 0x5a1   : > { %2093 = vmatpush.bf16.msrb.mxu1 %v2855_v23 }
 0x5a6   : > { %2763 = vmatmul.msk.bf16.vlgmr.msra.gmra.mxu0 %vm344_vm0, %v3398_v42 }
 0x5b0   : > { %2744 = vmatmul.msk.bf16.gmra.mxu3 %vm396_vm1, %v3495_v44  ;;  %2754 = vmatmul.msk.bf16.gmra.mxu1 %vm396_vm1, %v3473_v39 }
 0x5b6   : > { %2764 = vmatmul.msk.bf16.gmra.mxu0 %vm344_vm0, %v3407_v2 }
 0x5c0   : > { %2755 = vmatmul.msk.bf16.gmra.mxu1 %vm396_vm1, %v3484_v56  ;;  %2775 = vmatmul.msk.bf16.vlgmr.msra.gmra.mxu3 %vm344_vm0, %v3398_v42 }
 0x5d0   : > { %2756 = vmatmul.msk.bf16.gmra.mxu1 %vm396_vm1, %v3495_v44  ;;  %2776 = vmatmul.msk.bf16.gmra.mxu3 %vm344_vm0, %v3407_v2  ;;  %v1193_v44 = vmax.f32 %v3554_v41, 0.0 }
 0x5e0   : > { %2787 = vmatmul.msk.bf16.vlgmr.msrb.gmra.mxu1 %vm344_vm0, %v3398_v42  ;;  %v1201_v42 = vmax.f32 %v1122_v33, %v1193_v44  ;;  %v1590_v33 = vmax.f32 %v3695_v55, 0.0  ;;  %v1276_v55 = vmax.f32 %v3616_v32, 0.0  ;;  %v1592_v32 = vmax.f32 %v3702_v34, 0.0 }
 0x5e2   : > { %v1280_v36 = vmax.f32 %v1201_v42, %v1272_v19  ;;  %v1669_v42 = vmax.f32 %v3710_v30, 0.0  ;;  %v1355_v30 = vmax.f32 %v3629_v26, 0.0  ;;  %v1671_v26 = vmax.f32 %v3714_v38, 0.0 }
 0x5e3   : > { %v1725_v35 = vpop.f32.mrf.mxu0  ;;  %v1357_v38 = vmax.f32 %v3635_v17, 0.0  ;;  %v1673_v17 = vmax.f32 %v3720_v48, 0.0 }
 0x5e4   : > { %v1745_v39 = vmax.f32 %v1725_v35, 0.0  ;;  %v1359_v4 = vmax.f32 %v1280_v36, %v1351_v31 }
 0x5e6   : > { %v1753_v8 = vmax.f32 %v3700_v59, %v1745_v39  ;;  %v1430_v59 = vmax.f32 %v3627_v60, 0.0  ;;  %v1195_v60 = vmax.f32 %v3560_v58, 0.0  ;;  %v1511_v58 = vmax.f32 %v3688_v45, 0.0 }
 0x5e8   : > { %v1438_v62 = vmax.f32 %v1359_v4, %v1430_v59  ;;  %v1203_v35 = vmax.f32 %v1124_v11, %v1195_v60 }
 0x5eb   : > { %v1727_v63 = vpop.f32.mrf.mxu0 }
 0x5ec   : > { %v1746_v27 = vmax.f32 %v1727_v63, 0.0 }
 0x5f0   : > { %2788 = vmatmul.msk.bf16.gmra.mxu1 %vm344_vm0, %v3407_v2  ;;  %v1509_v2 = vmax.f32 %v3685_v22, 0.0 }
 0x5f2   : > { %v1517_v24 = vmax.f32 %v1438_v62, %v1509_v2 }
 0x5f3   : > { %v1730_v56 = vpop.f32.mrf.mxu0 }
 0x5f4   : > { %v1747_v1 = vmax.f32 %v1730_v56, 0.0 }
 0x5f6   : > { %v1755_v13 = vmax.f32 %v3706_v49, %v1747_v1  ;;  %v1588_v49 = vmax.f32 %v3690_v52, 0.0  ;;  %v1274_v52 = vmax.f32 %v3613_v40, 0.0 }
 0x5f8   : > { %v1596_v50 = vmax.f32 %v1517_v24, %v1588_v49 }
 0x5fa   : > { %v1675_v6 = vmax.f32 %v1596_v50, %v1667_v53  ;;  %v1513_v53 = vmax.f32 %v3693_v14, 0.0 }
 0x5fb   : > { %v1732_v7 = vpop.f32.mrf.mxu0 }
 0x5fc   : > { %v1754_v25 = vmax.f32 %v1675_v6, %v1746_v27  ;;  %v1748_v59 = vmax.f32 %v1732_v7, 0.0  ;;  %v1434_v7 = vmax.f32 %v3639_v15, 0.0 }
 0x603   : > { %v1735_v12 = vpop.f32.mrf.mxu0  ;;  %v1804_v61 = vpop.f32.mrf.mxu3 }
 0x604   : > { %v1749_v41 = vmax.f32 %v1735_v12, 0.0  ;;  %v1824_v5 = vmax.f32 %v1804_v61, 0.0  ;;  %v1126_v12 = vmax.f32 %v3552_v43, 0.0 }
 0x606   : > { %v1757_v51 = vmax.f32 %v3712_v18, %v1749_v41  ;;  %v1832_v57 = vmax.f32 %v1753_v8, %v1824_v5  ;;  %v1282_v18 = vmax.f32 %v1203_v35, %v1274_v52  ;;  %v1432_v8 = vmax.f32 %v3633_v29, 0.0 }
 0x607   : > { %v1197_v29 = vmax.f32 %v3564_v16, 0.0  ;;  %v1128_v35 = vmax.f32 %v3558_v46, 0.0  ;;  %v1515_v46 = vmax.f32 %v3698_v37, 0.0 }
 0x608   : > { %v1361_v63 = vmax.f32 %v1282_v18, %v1353_v28  ;;  %v1278_v28 = vmax.f32 %v3621_v20, 0.0  ;;  %v1594_v20 = vmax.f32 %v3708_v10, 0.0 }
 0x609   : > { %v1205_v41 = vmax.f32 %v1126_v12, %v1197_v29 }
 0x60a   : > { %v1440_v44 = vmax.f32 %v1361_v63, %v1432_v8 }
 0x60b   : > { %v3771_v9 = vpop.f32.mrf.mxu0  ;;  %v1806_v22 = vpop.f32.mrf.mxu3  ;;  %v1284_v5 = vmax.f32 %v1205_v41, %v1276_v55 }
 0x60c   : > { %v1825_v23 = vmax.f32 %v1806_v22, 0.0  ;;  %v1519_v40 = vmax.f32 %v1440_v44, %v1511_v58  ;;  %v1750_v15 = vmax.f32 %v3771_v9, 0.0 }
 0x60d   : > { %v1363_v24 = vmax.f32 %v1284_v5, %v1355_v30 }
 0x60e   : > { %v1833_v39 = vmax.f32 %v1754_v25, %v1825_v23  ;;  %v1598_v36 = vmax.f32 %v1519_v40, %v1590_v33  ;;  %v1199_v23 = vmax.f32 %v3570_v54, 0.0 }
 0x60f   : > { %v1442_v27 = vmax.f32 %v1363_v24, %v1434_v7 }
 0x610   : > { %v1677_v4 = vmax.f32 %v1598_v36, %v1669_v42  ;;  %v1207_v58 = vmax.f32 %v1128_v35, %v1199_v23 }
 0x611   : > { %v1521_v22 = vmax.f32 %v1442_v27, %v1513_v53  ;;  %v3814_v53 = vld [vmem:[%s3979_s5] sm:$0xff] }
 0x612   : > { %v1756_v61 = vmax.f32 %v1677_v4, %v1748_v59  ;;  %v1286_v9 = vmax.f32 %v1207_v58, %v1278_v28 }
 0x613   : > { %v1740_v56 = vpop.f32.mrf.mxu0  ;;  %v1809_v1 = vpop.f32.mrf.mxu3  ;;  %v1600_v25 = vmax.f32 %v1521_v22, %v1592_v32 }
 0x614   : > { %v1751_v47 = vmax.f32 %v1740_v56, 0.0  ;;  %v1826_v19 = vmax.f32 %v1809_v1, 0.0  ;;  %v1365_v54 = vmax.f32 %v1286_v9, %v1357_v38  ;;  %v3836_v38 = vld [vmem:[%s3979_s5 + $0x10] sm:$0xff] }
 0x615   : > { %v1679_v14 = vmax.f32 %v1600_v25, %v1671_v26 }
 0x616   : > { %v1759_v31 = vmax.f32 %v3718_v0, %v1751_v47  ;;  %v1834_v21 = vmax.f32 %v1755_v13, %v1826_v19 }
 0x617   : > { %v1758_v8 = vmax.f32 %v1679_v14, %v1750_v15 }
 0x61b   : > { %v3782_v2 = vpop.f32.mrf.mxu0  ;;  %v1811_v45 = vpop.f32.mrf.mxu3 }
 0x61c   : > { %v1827_v62 = vmax.f32 %v1811_v45, 0.0 }
 0x61d   : > { %v1883_v49 = vpop.f32.mrf.mxu1 }
 0x61e   : > { %v1835_v0 = vmax.f32 %v1756_v61, %v1827_v62  ;;  %v1903_v13 = vmax.f32 %v1883_v49, 0.0 }
 0x620   : > { %v3788_v16 = vmax.f32 %v1832_v57, %v1903_v13 }
 0x623   : > { %v1814_v50 = vpop.f32.mrf.mxu3  ;;  %v1937_v43 = vpop.f32.mrf.mxu0 }
 0x624   : > { %v1828_v60 = vmax.f32 %v1814_v50, 0.0  ;;  %v1947_v10 = vmax.f32 %v1937_v43, 0.0 }
 0x625   : > { %v1885_v6 = vpop.f32.mrf.mxu1 }
 0x626   : > { %v1836_v11 = vmax.f32 %v1757_v51, %v1828_v60  ;;  %v1904_v52 = vmax.f32 %v1885_v6, 0.0 }
 0x628   : > { %v3794_v57 = vmax.f32 %v1833_v39, %v1904_v52  ;;  %v1436_v39 = vmax.f32 %v3645_v3, 0.0  ;;  %v1752_v3 = vmax.f32 %v3782_v2, 0.0 }
 0x62a   : > { %v1444_v33 = vmax.f32 %v1365_v54, %v1436_v39 }
 0x62b   : > { %v1816_v34 = vpop.f32.mrf.mxu3  ;;  %v1939_v18 = vpop.f32.mrf.mxu0 }
 0x62c   : > { %v1829_v63 = vmax.f32 %v1816_v34, 0.0  ;;  %v1523_v42 = vmax.f32 %v1444_v33, %v1515_v46  ;;  %v1948_v62 = vmax.f32 %v1939_v18, 0.0  ;;  %v2856_v34 = vld [vmem:[%s3227_s30 + $0x70] sm:$0xff]  ;;  %v3845_v46 = vld [vmem:[%s3979_s5 + $0x18] sm:$0xff] }
 0x62d   : > { %v1888_v51 = vpop.f32.mrf.mxu1 }
 0x62e   : > { %v1837_v56 = vmax.f32 %v1758_v8, %v1829_v63  ;;  %v1905_v1 = vmax.f32 %v1888_v51, 0.0  ;;  %v1602_v4 = vmax.f32 %v1523_v42, %v1594_v20  ;;  %v2857_v8 = vld [vmem:[%s3227_s30 + $0x78] sm:$0xff] }
 0x630   : > { %v3801_v44 = vmax.f32 %v1834_v21, %v1905_v1  ;;  %v1681_v45 = vmax.f32 %v1602_v4, %v1673_v17 }
 0x632   : > { %v1760_v37 = vmax.f32 %v1681_v45, %v1752_v3 }
 0x633   : > { %v1819_v47 = vpop.f32.mrf.mxu3  ;;  %v1942_v19 = vpop.f32.mrf.mxu0 }
 0x634   : > { %v1830_v40 = vmax.f32 %v1819_v47, 0.0  ;;  %v1949_v12 = vmax.f32 %v1942_v19, 0.0  ;;  %v2919_v47 = vld [vmem:[%s3978_s4] sm:$0xff]  ;;  %v2920_v19 = vld [vmem:[%s3978_s4 + $0x8] sm:$0xff] }
 0x635   : > { %v1890_v36 = vpop.f32.mrf.mxu1 }
 0x636   : > { %v1838_v59 = vmax.f32 %v1759_v31, %v1830_v40  ;;  %v1906_v29 = vmax.f32 %v1890_v36, 0.0  ;;  %v1951_v31 = vpack.c.bf16 %v1948_v62, %v1947_v10 }
 0x638   : > { %v3807_v21 = vmax.f32 %v1835_v0, %v1906_v29 }
 0x63b   : > { %v1821_v55 = vpop.f32.mrf.mxu3  ;;  %v1944_v61 = vpop.f32.mrf.mxu0 }
 0x63c   : > { %v1831_v49 = vmax.f32 %v1821_v55, 0.0  ;;  %v1950_v41 = vmax.f32 %v1944_v61, 0.0 }
 0x63d   : > { %v1893_v30 = vpop.f32.mrf.mxu1 }
 0x63e   : > { %v1839_v13 = vmax.f32 %v1760_v37, %v1831_v49  ;;  %v1952_v48 = vpack.c.bf16 %v1950_v41, %v1949_v12  ;;  %v1907_v5 = vmax.f32 %v1893_v30, 0.0 }
 0x640   : > { %v3809_v7 = vmax.f32 %v1836_v11, %v1907_v5  ;;  %1959 = vmatpush.bf16.msrb.mxu2 %v1952_v48  ;;  %v3825_v11 = vld [vmem:[%s3979_s5 + $0x8] sm:$0xff] }
 0x643   : > { %v2016_v2 = vpop.f32.mrf.mxu3 }
 0x644   : > { %1960 = vmatpush.bf16.msrb.mxu2 %v1951_v31  ;;  %v2026_v18 = vmax.f32 %v2016_v2, 0.0 }
 0x645   : > { %v1895_v0 = vpop.f32.mrf.mxu1 }
 0x646   : > { %v1908_v24 = vmax.f32 %v1895_v0, 0.0 }
 0x647   : > { %2765 = vmatmul.msk.bf16.vlgmr.msrb.gmra.mxu2 %vm396_vm1, %v3814_v53 }
 0x648   : > { %v3818_v50 = vmax.f32 %v1837_v56, %v1908_v24  ;;  %2172 = vmatpush.bf16.msra.mxu2 %v2856_v34 }
 0x64b   : > { %v2018_v43 = vpop.f32.mrf.mxu3 }
 0x64c   : > { %v2027_v35 = vmax.f32 %v2018_v43, 0.0 }
 0x64d   : > { %v1898_v27 = vpop.f32.mrf.mxu1 }
 0x64e   : > { %v1909_v32 = vmax.f32 %v1898_v27, 0.0  ;;  %v2030_v63 = vpack.c.bf16 %v2027_v35, %v2026_v18 }
 0x650   : > { %v3820_v60 = vmax.f32 %v1838_v59, %v1909_v32 }
 0x653   : > { %v2021_v6 = vpop.f32.mrf.mxu3 }
 0x654   : > { %v2028_v15 = vmax.f32 %v2021_v6, 0.0 }
 0x655   : > { %v1900_v22 = vpop.f32.mrf.mxu1 }
 0x656   : > { %v1910_v26 = vmax.f32 %v1900_v22, 0.0 }
 0x657   : > { %2766 = vmatmul.msk.bf16.gmra.mxu2 %vm396_vm1, %v3825_v11 }
 0x658   : > { %v3829_v52 = vmax.f32 %v1839_v13, %v1910_v26 }
 0x65b   : > { %v2023_v25 = vpop.f32.mrf.mxu3 }
 0x65c   : > { %v2029_v23 = vmax.f32 %v2023_v25, 0.0 }
 0x65d   : > { %v2095_v14 = vpop.f32.mrf.mxu1 }
 0x65e   : > { %v2031_v28 = vpack.c.bf16 %v2029_v23, %v2028_v15  ;;  %v2105_v9 = vmax.f32 %v2095_v14, 0.0 }
 0x660   : > { %2038 = vmatpush.bf16.msrb.mxu0 %v2031_v28 }
 0x664   : > { %2039 = vmatpush.bf16.msrb.mxu0 %v2030_v63 }
 0x665   : > { %v2097_v58 = vpop.f32.mrf.mxu1 }
 0x666   : > { %v2106_v39 = vmax.f32 %v2097_v58, 0.0 }
 0x667   : > { %2767 = vmatmul.msk.bf16.gmra.mxu2 %vm396_vm1, %v3836_v38  ;;  %2777 = vmatmul.msk.bf16.vlgmr.msrb.gmra.mxu0 %vm396_vm1, %v3814_v53 }
 0x668   : > { %2251 = vmatpush.bf16.msra.mxu0 %v2857_v8  ;;  %v2109_v20 = vpack.c.bf16 %v2106_v39, %v2105_v9 }
 0x66d   : > { %v2100_v51 = vpop.f32.mrf.mxu1 }
 0x66e   : > { %v2107_v56 = vmax.f32 %v2100_v51, 0.0 }
 0x675   : > { %v2102_v1 = vpop.f32.mrf.mxu1 }
 0x676   : > { %v2108_v54 = vmax.f32 %v2102_v1, 0.0 }
 0x677   : > { %2768 = vmatmul.msk.bf16.gmra.mxu2 %vm396_vm1, %v3845_v46  ;;  %2778 = vmatmul.msk.bf16.gmra.mxu0 %vm396_vm1, %v3825_v11 }
 0x678   : > { %v2110_v33 = vpack.c.bf16 %v2108_v54, %v2107_v56 }
 0x67a   : > { %2117 = vmatpush.bf16.msrb.mxu3 %v2110_v33 }
 0x67e   : > { %2118 = vmatpush.bf16.msrb.mxu3 %v2109_v20 }
 0x681   : > { %2789 = vmatmul.msk.bf16.vlgmr.msrb.gmra.mxu3 %vm396_vm1, %v3814_v53 }
 0x687   : > { %2779 = vmatmul.msk.bf16.gmra.mxu0 %vm396_vm1, %v3836_v38  ;;  %2799 = vmatmul.msk.bf16.vlgmr.msra.gmra.mxu2 %vm344_vm0, %v2919_v47 }
 0x691   : > { %2790 = vmatmul.msk.bf16.gmra.mxu3 %vm396_vm1, %v3825_v11 }
 0x697   : > { %2780 = vmatmul.msk.bf16.gmra.mxu0 %vm396_vm1, %v3845_v46  ;;  %2800 = vmatmul.msk.bf16.gmra.mxu2 %vm344_vm0, %v2920_v19 }
 0x6a1   : > { %2791 = vmatmul.msk.bf16.gmra.mxu3 %vm396_vm1, %v3836_v38 }
 0x6a7   : > { %2811 = vmatmul.msk.bf16.vlgmr.msra.gmra.mxu0 %vm344_vm0, %v2919_v47 }
 0x6b1   : > { %2792 = vmatmul.msk.bf16.gmra.mxu3 %vm396_vm1, %v3845_v46 }
 0x6b7   : > { %2812 = vmatmul.msk.bf16.gmra.mxu0 %vm344_vm0, %v2920_v19 }
 0x6ca   : > { %v1962_v40 = vpop.f32.mrf.mxu2 }
 0x6cb   : > { %v1982_v42 = vmax.f32 %v1962_v40, 0.0 }
 0x6cd   : > { %v1990_v17 = vmax.f32 %v3788_v16, %v1982_v42 }
 0x6d2   : > { %v1964_v36 = vpop.f32.mrf.mxu2 }
 0x6d3   : > { %v1983_v59 = vmax.f32 %v1964_v36, 0.0 }
 0x6d5   : > { %v1991_v29 = vmax.f32 %v3794_v57, %v1983_v59 }
 0x6da   : > { %v1967_v4 = vpop.f32.mrf.mxu2 }
 0x6db   : > { %v1984_v3 = vmax.f32 %v1967_v4, 0.0 }
 0x6dd   : > { %v1992_v45 = vmax.f32 %v3801_v44, %v1984_v3 }
 0x6e2   : > { %v1969_v12 = vpop.f32.mrf.mxu2 }
 0x6e3   : > { %v1985_v37 = vmax.f32 %v1969_v12, 0.0 }
 0x6e4   : > { %v2041_v55 = vpop.f32.mrf.mxu0 }
 0x6e5   : > { %v1993_v61 = vmax.f32 %v3807_v21, %v1985_v37  ;;  %v2061_v10 = vmax.f32 %v2041_v55, 0.0 }
 0x6e7   : > { %v3877_v62 = vmax.f32 %v1990_v17, %v2061_v10 }
 0x6ea   : > { %v1972_v49 = vpop.f32.mrf.mxu2 }
 0x6eb   : > { %v1986_v41 = vmax.f32 %v1972_v49, 0.0 }
 0x6ec   : > { %v2043_v30 = vpop.f32.mrf.mxu0 }
 0x6ed   : > { %v1994_v16 = vmax.f32 %v3809_v7, %v1986_v41  ;;  %v2062_v13 = vmax.f32 %v2043_v30, 0.0 }
 0x6ef   : > { %v3880_v48 = vmax.f32 %v1991_v29, %v2062_v13 }
 0x6f2   : > { %v1974_v57 = vpop.f32.mrf.mxu2 }
 0x6f3   : > { %v1987_v5 = vmax.f32 %v1974_v57, 0.0 }
 0x6f4   : > { %v2046_v31 = vpop.f32.mrf.mxu0 }
 0x6f5   : > { %v1995_v44 = vmax.f32 %v3818_v50, %v1987_v5  ;;  %v2063_v2 = vmax.f32 %v2046_v31, 0.0 }
 0x6f7   : > { %v3883_v0 = vmax.f32 %v1992_v45, %v2063_v2 }
 0x6fa   : > { %v1977_v21 = vpop.f32.mrf.mxu2 }
 0x6fb   : > { %v1988_v24 = vmax.f32 %v1977_v21, 0.0 }
 0x6fc   : > { %v2048_v43 = vpop.f32.mrf.mxu0 }
 0x6fd   : > { %v1996_v27 = vmax.f32 %v3820_v60, %v1988_v24  ;;  %v2064_v32 = vmax.f32 %v2048_v43, 0.0 }
 0x6ff   : > { %v3886_v6 = vmax.f32 %v1993_v61, %v2064_v32 }
 0x702   : > { %v1979_v7 = vpop.f32.mrf.mxu2 }
 0x703   : > { %v1989_v22 = vmax.f32 %v1979_v7, 0.0 }
 0x704   : > { %v2051_v26 = vpop.f32.mrf.mxu0  ;;  %v2120_v45 = vpop.f32.mrf.mxu3 }
 0x705   : > { %v1997_v25 = vmax.f32 %v3829_v52, %v1989_v22  ;;  %v2065_v15 = vmax.f32 %v2051_v26, 0.0 }
 0x707   : > { %v3889_v23 = vmax.f32 %v1994_v16, %v2065_v15 }
 0x70a   : > { %v2174_v50 = vpop.f32.mrf.mxu2 }
 0x70b   : > { %v2184_v9 = vmax.f32 %v2174_v50, 0.0 }
 0x70c   : > { %v2053_v14 = vpop.f32.mrf.mxu0  ;;  %v2122_v37 = vpop.f32.mrf.mxu3 }
 0x70d   : > { %v2066_v35 = vmax.f32 %v2053_v14, 0.0  ;;  %v2141_v13 = vmax.f32 %v2122_v37, 0.0 }
 0x70f   : > { %v3891_v28 = vmax.f32 %v1995_v44, %v2066_v35 }
 0x712   : > { %v2176_v34 = vpop.f32.mrf.mxu2 }
 0x713   : > { %v2185_v39 = vmax.f32 %v2176_v34, 0.0 }
 0x714   : > { %v2056_v18 = vpop.f32.mrf.mxu0  ;;  %v2125_v10 = vpop.f32.mrf.mxu3 }
 0x715   : > { %v2067_v8 = vmax.f32 %v2056_v18, 0.0  ;;  %v2188_v47 = vpack.c.bf16 %v2185_v39, %v2184_v9  ;;  %v2142_v24 = vmax.f32 %v2125_v10, 0.0 }
 0x717   : > { %v3893_v60 = vmax.f32 %v1996_v27, %v2067_v8 }
 0x71a   : > { %v2179_v63 = vpop.f32.mrf.mxu2 }
 0x71b   : > { %v2186_v1 = vmax.f32 %v2179_v63, 0.0 }
 0x71c   : > { %v2058_v58 = vpop.f32.mrf.mxu0 }
 0x71d   : > { %v2068_v51 = vmax.f32 %v2058_v58, 0.0 }
 0x71f   : > { %v3895_v56 = vmax.f32 %v1997_v25, %v2068_v51 }
 0x722   : > { %v2181_v52 = vpop.f32.mrf.mxu2 }
 0x723   : > { %v2187_v54 = vmax.f32 %v2181_v52, 0.0 }
 0x724   : > { %v2253_v33 = vpop.f32.mrf.mxu0 }
 0x725   : > { %v2189_v20 = vpack.c.bf16 %v2187_v54, %v2186_v1  ;;  %v2263_v4 = vmax.f32 %v2253_v33, 0.0 }
 0x727   : > { %2196 = vmatpush.bf16.msra.mxu1 %v2189_v20 }
 0x72b   : > { %2197 = vmatpush.bf16.msra.mxu1 %v2188_v47 }
 0x72c   : > { %v2255_v19 = vpop.f32.mrf.mxu0 }
 0x72d   : > { %v2264_v59 = vmax.f32 %v2255_v19, 0.0 }
 0x72e   : > { %2801 = vmatmul.msk.bf16.vlgmr.msra.gmra.mxu1 %vm396_vm1, %v3814_v53 }
 0x72f   : > { %v2267_v3 = vpack.c.bf16 %v2264_v59, %v2263_v4 }
 0x734   : > { %v2258_v40 = vpop.f32.mrf.mxu0 }
 0x735   : > { %v2265_v17 = vmax.f32 %v2258_v40, 0.0 }
 0x73c   : > { %v2260_v42 = vpop.f32.mrf.mxu0 }
 0x73d   : > { %v2266_v36 = vmax.f32 %v2260_v42, 0.0 }
 0x73e   : > { %2802 = vmatmul.msk.bf16.gmra.mxu1 %vm396_vm1, %v3825_v11 }
 0x73f   : > { %v2268_v29 = vpack.c.bf16 %v2266_v36, %v2265_v17 }
 0x741   : > { %2275 = vmatpush.bf16.msrb.mxu2 %v2268_v29 }
 0x745   : > { %2276 = vmatpush.bf16.msrb.mxu2 %v2267_v3 }
 0x748   : > { %2813 = vmatmul.msk.bf16.vlgmr.msrb.gmra.mxu2 %vm396_vm1, %v3814_v53  ;;  %v2140_v53 = vmax.f32 %v2120_v45, 0.0 }
 0x74a   : > { %v2148_v49 = vmax.f32 %v3877_v62, %v2140_v53  ;;  %v2150_v62 = vmax.f32 %v3883_v0, %v2142_v24 }
 0x74e   : > { %2803 = vmatmul.msk.bf16.gmra.mxu1 %vm396_vm1, %v3836_v38 }
 0x758   : > { %2814 = vmatmul.msk.bf16.gmra.mxu2 %vm396_vm1, %v3825_v11 }
 0x75e   : > { %2804 = vmatmul.msk.bf16.gmra.mxu1 %vm396_vm1, %v3845_v46 }
 0x768   : > { %2815 = vmatmul.msk.bf16.gmra.mxu2 %vm396_vm1, %v3836_v38  ;;  %v2149_v38 = vmax.f32 %v3880_v48, %v2141_v13 }
 0x778   : > { %2816 = vmatmul.msk.bf16.gmra.mxu2 %vm396_vm1, %v3845_v46  ;;  %v2127_v46 = vpop.f32.mrf.mxu3 }
 0x779   : > { %v2143_v25 = vmax.f32 %v2127_v46, 0.0 }
 0x77b   : > { %v2151_v48 = vmax.f32 %v3886_v6, %v2143_v25 }
 0x780   : > { %v2130_v26 = vpop.f32.mrf.mxu3 }
 0x781   : > { %v2144_v8 = vmax.f32 %v2130_v26, 0.0 }
 0x783   : > { %v2152_v1 = vmax.f32 %v3889_v23, %v2144_v8 }
 0x788   : > { %v2132_v58 = vpop.f32.mrf.mxu3 }
 0x789   : > { %v2145_v54 = vmax.f32 %v2132_v58, 0.0 }
 0x78b   : > { %v2153_v6 = vmax.f32 %v3891_v28, %v2145_v54 }
 0x790   : > { %v2135_v47 = vpop.f32.mrf.mxu3 }
 0x791   : > { %v2146_v36 = vmax.f32 %v2135_v47, 0.0 }
 0x793   : > { %v2154_v23 = vmax.f32 %v3893_v60, %v2146_v36 }
 0x798   : > { %v2137_v4 = vpop.f32.mrf.mxu3 }
 0x7ab   : > { %v2199_v12 = vpop.f32.mrf.mxu1 }
 0x7ac   : > { %v2219_v61 = vmax.f32 %v2199_v12, 0.0 }
 0x7ae   : > { %v2227_v30 = vmax.f32 %v2148_v49, %v2219_v61 }
 0x7b3   : > { %v2201_v55 = vpop.f32.mrf.mxu1 }
 0x7b4   : > { %v2220_v5 = vmax.f32 %v2201_v55, 0.0  ;;  %v2147_v55 = vmax.f32 %v2137_v4, 0.0 }
 0x7b6   : > { %v2228_v44 = vmax.f32 %v2149_v38, %v2220_v5  ;;  %v2155_v28 = vmax.f32 %v3895_v56, %v2147_v55 }
 0x7bb   : > { %v2204_v41 = vpop.f32.mrf.mxu1 }
 0x7bc   : > { %v2221_v27 = vmax.f32 %v2204_v41, 0.0 }
 0x7be   : > { %v2229_v7 = vmax.f32 %v2150_v62, %v2221_v27 }
 0x7c3   : > { %v2206_v21 = vpop.f32.mrf.mxu1 }
 0x7c4   : > { %v2222_v14 = vmax.f32 %v2206_v21, 0.0 }
 0x7c6   : > { %v2230_v34 = vmax.f32 %v2151_v48, %v2222_v14 }
 0x7cb   : > { %v2278_v11 = vpop.f32.mrf.mxu2  ;;  %v2209_v50 = vpop.f32.mrf.mxu1 }
 0x7cc   : > { %v2298_v16 = vmax.f32 %v2278_v11, 0.0  ;;  %v2223_v51 = vmax.f32 %v2209_v50, 0.0 }
 0x7ce   : > { %v2306_v57 = vmax.f32 %v2227_v30, %v2298_v16  ;;  %v2231_v9 = vmax.f32 %v2152_v1, %v2223_v51 }
 0x7d0   : > { %2322 = vxpose.xlu0.b32.cont [9/16] %v2306_v57, 128 }
 0x7d3   : > { %v2280_v31 = vpop.f32.mrf.mxu2  ;;  %v2211_v0 = vpop.f32.mrf.mxu1 }
 0x7d4   : > { %v2299_v2 = vmax.f32 %v2280_v31, 0.0  ;;  %v2224_v20 = vmax.f32 %v2211_v0, 0.0 }
 0x7d6   : > { %v2307_v43 = vmax.f32 %v2228_v44, %v2299_v2  ;;  %v2232_v42 = vmax.f32 %v2153_v6, %v2224_v20 }
 0x7d8   : > { %2323 = vxpose.xlu0.b32.cont [10/16] %v2307_v43, 128 }
 0x7db   : > { %v2283_v32 = vpop.f32.mrf.mxu2  ;;  %v2214_v19 = vpop.f32.mrf.mxu1 }
 0x7dc   : > { %v2300_v22 = vmax.f32 %v2283_v32, 0.0  ;;  %v2225_v29 = vmax.f32 %v2214_v19, 0.0 }
 0x7de   : > { %v2308_v15 = vmax.f32 %v2229_v7, %v2300_v22  ;;  %v2233_v45 = vmax.f32 %v2154_v23, %v2225_v29 }
 0x7e0   : > { %2324 = vxpose.xlu0.b32.cont [11/16] %v2308_v15, 128 }
 0x7e3   : > { %v2285_v35 = vpop.f32.mrf.mxu2  ;;  %v2216_v37 = vpop.f32.mrf.mxu1 }
 0x7e4   : > { %v2301_v18 = vmax.f32 %v2285_v35, 0.0  ;;  %v2226_v61 = vmax.f32 %v2216_v37, 0.0 }
 0x7e6   : > { %v2309_v63 = vmax.f32 %v2230_v34, %v2301_v18  ;;  %v2234_v49 = vmax.f32 %v2155_v28, %v2226_v61 }
 0x7e8   : > { %2325 = vxpose.xlu0.b32.cont [12/16] %v2309_v63, 128 }
 0x7eb   : > { %v2288_v52 = vpop.f32.mrf.mxu2 }
 0x7ec   : > { %v2302_v39 = vmax.f32 %v2288_v52, 0.0 }
 0x7ee   : > { %v2310_v33 = vmax.f32 %v2231_v9, %v2302_v39 }
 0x7f0   : > { %2326 = vxpose.xlu0.b32.cont [13/16] %v2310_v33, 128 }
 0x7f3   : > { %v2290_v40 = vpop.f32.mrf.mxu2 }
 0x7f4   : > { %v2303_v17 = vmax.f32 %v2290_v40, 0.0 }
 0x7f6   : > { %v2311_v59 = vmax.f32 %v2232_v42, %v2303_v17 }
 0x7f8   : > { %2327 = vxpose.xlu0.b32.cont [14/16] %v2311_v59, 128 }
 0x7fb   : > { %v2293_v3 = vpop.f32.mrf.mxu2 }
 0x7fc   : > { %v2304_v12 = vmax.f32 %v2293_v3, 0.0 }
 0x7fe   : > { %v2312_v53 = vmax.f32 %v2233_v45, %v2304_v12 }
 0x800   : > { %2328 = vxpose.xlu0.b32.cont [15/16] %v2312_v53, 128 }
 0x803   : > { %v2295_v10 = vpop.f32.mrf.mxu2 }
 0x804   : > { %v2305_v41 = vmax.f32 %v2295_v10, 0.0 }
 0x806   : > { %v2313_v11 = vmax.f32 %v2234_v49, %v2305_v41 }
 0x808   : > { %2329 = vxpose.xlu0.b32.end [16/16] %v2313_v11, 128 }
 0x834   : > { %v2330_v30 = vpop.trf.xlu0 }
 0x835   : > { %2346 = vst [vmem:[%s3923_s20] sm:$0xff] %v2330_v30 }
 0x83c   : > { %v2331_v60 = vpop.trf.xlu0 }
 0x83d   : > { %2347 = vst [vmem:[%s3923_s20 + $0x8] sm:$0xff] %v2331_v60 }
 0x844   : > { %v2332_v56 = vpop.trf.xlu0 }
 0x845   : > { %2348 = vst [vmem:[%s3923_s20 + $0x10] sm:$0xff] %v2332_v56 }
 0x84c   : > { %v2333_v16 = vpop.trf.xlu0 }
 0x84d   : > { %2349 = vst [vmem:[%s3923_s20 + $0x18] sm:$0xff] %v2333_v16 }
 0x854   : > { %v2334_v13 = vpop.trf.xlu0 }
 0x855   : > { %2350 = vst [vmem:[%s3923_s20 + $0x20] sm:$0xff] %v2334_v13 }
 0x85c   : > { %v2335_v57 = vpop.trf.xlu0 }
 0x85d   : > { %2351 = vst [vmem:[%s3923_s20 + $0x28] sm:$0xff] %v2335_v57 }
 0x864   : > { %v2336_v5 = vpop.trf.xlu0 }
 0x865   : > { %2352 = vst [vmem:[%s3923_s20 + $0x30] sm:$0xff] %v2336_v5 }
 0x86c   : > { %v2337_v38 = vpop.trf.xlu0 }
 0x86d   : > { %2353 = vst [vmem:[%s3923_s20 + $0x38] sm:$0xff] %v2337_v38 }
 0x874   : > { %v2338_v46 = vpop.trf.xlu0 }
 0x875   : > { %2354 = vst [vmem:[%s3923_s20 + $0x40] sm:$0xff] %v2338_v46 }
 0x87c   : > { %v2339_v31 = vpop.trf.xlu0 }
 0x87d   : > { %2355 = vst [vmem:[%s3923_s20 + $0x48] sm:$0xff] %v2339_v31 }
 0x884   : > { %v2340_v44 = vpop.trf.xlu0 }
 0x885   : > { %2356 = vst [vmem:[%s3923_s20 + $0x50] sm:$0xff] %v2340_v44 }
 0x88c   : > { %v2341_v2 = vpop.trf.xlu0 }
 0x88d   : > { %2357 = vst [vmem:[%s3923_s20 + $0x58] sm:$0xff] %v2341_v2 }
 0x894   : > { %v2342_v21 = vpop.trf.xlu0 }
 0x895   : > { %2358 = vst [vmem:[%s3923_s20 + $0x60] sm:$0xff] %v2342_v21 }
 0x89c   : > { %v2343_v24 = vpop.trf.xlu0 }
 0x89d   : > { %2359 = vst [vmem:[%s3923_s20 + $0x68] sm:$0xff] %v2343_v24 }
 0x8a4   : > { %v2344_v43 = vpop.trf.xlu0 }
 0x8a5   : > { %2360 = vst [vmem:[%s3923_s20 + $0x70] sm:$0xff] %v2344_v43 }
 0x8ac   : > { %v2345_v27 = vpop.trf.xlu0 }
 0x8ad   : > { %2361 = vst [vmem:[%s3923_s20 + $0x78] sm:$0xff] %v2345_v27 }
 0x8ae   : > { %3008 = shalt.err (!%p3005_p3)
}
 0x8af   : > { %s3056_s0 = smov 128   ;;  %s3057_s11 = smov 8  }
 0x8b0   : > { %2863 = dma.vmem_to_hbm [thread:$0]  (%p3142_p10), %s2376_s15, 2048, %s2378_s16, %s2363_s17, %s3056_s0, %s3056_s0, %s3057_s11  }
 0x8b1 PF: > { %p2877_p4 = scmp.ge.s32.totalorder %s3051_s24, 2  ;;  %s2392_s28 = sand.u32 1, %s3039_s21  }
 0x8b2   : > { %s2393_s27 = scalar_lea.sflag [#allocation4], %s2392_s28 }
 0x8b3   : > { %p2873_p13 = pnand %p2877_p4, %p3146_p11 }
 0x8b5   : > { %p2874_p5 = pneg %p2873_p13 }
 0x8b7   : > { %3034 = dma.done.wait (%p2874_p5), %s2393_s27, 2048  }
 0x8b8   : > { %3036 = vsyncadd (%p2874_p5), %s2393_s27, 4294965248  ;;  %s4000_s24 = sld [smem:[#allocation12_spill]]  ;;  %s4003_s21 = smov %s3043_s22 }
 0x8b9   : > { %s4001_s12 = sld [smem:[#allocation11_spill]] }
 0x8ba   : > { %s4002_s23 = sld [smem:[#allocation13_spill]] }
 0x8be   : > { %p22_p7 = scmp.ge.s32.totalorder %s4000_s24, 6  }
 0x8bf   : > { %s4004_s22 = smov %s4001_s12 }
 0x8c0   :  { %24 = sbr.rel (!%p22_p7) target bundleno = 9 (0x9), region = 124 }
 0x8c5   :  { %2399 = vsyncpa [#allocation3], 1 }
 0x8c6   :  { %2401 = vsyncpa [#allocation3 + $0x1], 1 }
 0x8c7   :  { %2402 = vsyncpa [#allocation6], 1 }
 0x8c8   :  { %2404 = vsyncpa [#allocation6 + $0x1], 1 }
 0x8c9   :  { %2405 = vsyncpa [#allocation4], 1 }
 0x8ca   :  { %2407 = vsyncpa [#allocation4 + $0x1], 1 }

</bundles_post_ra>
